<compile_context>
chip_gen: v6e
topology: v6e:2x2x1
jax: 0.10.0
libtpu: 0.0.40
codegen_flags: <defaults>
</compile_context>

<pallas_src>
import jax
import jax.numpy as jnp
from jax.experimental import pallas as pl
from jax.experimental.pallas import tpu as pltpu


# ----------------------------- in-kernel math -------------------------------

_ERF_P = 0.3275911
_ERF_A1 = 0.254829592
_ERF_A2 = -0.284496736
_ERF_A3 = 1.421413741
_ERF_A4 = -1.453152027
_ERF_A5 = 1.061405429
_INV_SQRT2 = 0.7071067811865476


def _gelu(x):
    # PyTorch nn.GELU() (exact erf) via Abramowitz & Stegun 7.1.26
    # (|err| < 1.5e-7); exp() and the approx reciprocal use the EUP slot.
    xs = x * _INV_SQRT2
    ax = jnp.abs(xs)
    t = pl.reciprocal(1.0 + _ERF_P * ax, approx=True)
    poly = ((((_ERF_A5 * t + _ERF_A4) * t + _ERF_A3) * t + _ERF_A2) * t
            + _ERF_A1) * t
    erf = 1.0 - poly * jnp.exp(-ax * ax)
    erf = jnp.where(xs < 0, -erf, erf)
    return 0.5 * x * (1.0 + erf)


# --------------------------------- kernel -----------------------------------

def _make_down_kernel(B, H, W, Cin, Cout):
    L1 = B * W * Cin          # lane width of Cin-channel activations
    L2 = B * W * Cout         # lane width of Cout-channel activations
    inv_n1 = 1.0 / float(H * W * Cin)     # per-sample GN element counts
    inv_n2 = 1.0 / float(H * W * Cout)

    def fill_im2col(im_ref, act, L):
        # Write the three vertical-tap column blocks [act[h-1]|act[h]|act[h+1]]
        # of the im2col matrix.  The two halo rows (row 0 of tap 0, row H-1 of
        # tap 2) were zeroed once at kernel start and are never overwritten.
        im_ref[pl.ds(1, H - 1), pl.ds(0, L)] = act[0:H - 1, :]
        im_ref[:, pl.ds(L, L)] = act
        im_ref[pl.ds(0, H - 1), pl.ds(2 * L, L)] = act[1:H, :]

    def conv(im_ref, w_ref):
        # ONE MXU matmul per 3x3 conv: im2col-in-K (K = 3*B*W*Cin), bf16
        # operands, f32 accumulation.
        return jnp.dot(im_ref[...].astype(jnp.bfloat16), w_ref[...],
                       preferred_element_type=jnp.float32)

    def group_norm(h, gn_ref, sel_ref, inv_n):
        # GroupNorm(num_groups=1) with the batch folded onto lanes: one-pass
        # f32 sum / sum-of-squares over H, per-sample segmented lane sums via
        # a tiny (L,L) same-sample 0/1 matmul, applied as one FMA per element.
        s = jnp.concatenate([jnp.sum(h, axis=0, keepdims=True),
                             jnp.sum(h * h, axis=0, keepdims=True)], axis=0)
        tot = jnp.dot(s, sel_ref[...], preferred_element_type=jnp.float32)
        mu = tot[0:1, :] * inv_n
        var = tot[1:2, :] * inv_n - mu * mu
        scale = jax.lax.rsqrt(var + 1e-5) * gn_ref[0:1, :]
        shift = gn_ref[1:2, :] - mu * scale
        return h * scale + shift

    def kernel(x_ref, t_ref, t1_ref, t2_ref, t3_ref, t4_ref,
               gn1_ref, gn2_ref, gn3_ref, gn4_ref,
               sel1_ref, sel2_ref, we_ref, be_ref,
               out_ref, im1, im2):
        # Zero the im2col scratches once; their interiors are fully
        # overwritten before every conv, only the halo rows stay zero.
        im1[...] = jnp.zeros_like(im1)
        im2[...] = jnp.zeros_like(im2)

        x = x_ref[...]                                   # (H, B*W*Cin) f32

        # ---- DoubleConv #1 (residual): conv -> GN -> GELU -> conv -> GN ----
        fill_im2col(im1, x, L1)
        h = conv(im1, t1_ref)
        h = _gelu(group_norm(h, gn1_ref, sel1_ref, inv_n1))
        fill_im2col(im1, h, L1)
        h = conv(im1, t2_ref)
        h = group_norm(h, gn2_ref, sel1_ref, inv_n1)
        h = _gelu(x + h)                                 # GELU(x + dc(x))

        # ---- DoubleConv #2: conv -> GN -> GELU -> conv -> GN ----
        fill_im2col(im1, h, L1)
        h = conv(im1, t3_ref)                            # (H, B*W*Cout)
        h = _gelu(group_norm(h, gn3_ref, sel2_ref, inv_n2))
        fill_im2col(im2, h, L2)
        h = conv(im2, t4_ref)
        h = group_norm(h, gn4_ref, sel2_ref, inv_n2)

        # ---- time embedding: SiLU -> Linear (block-diag over B, tiled W) ----
        tv = t_ref[...]                                  # (1, B*emb_dim) f32
        silu = tv * pl.reciprocal(1.0 + jnp.exp(-tv), approx=True)
        emb = jnp.dot(silu, we_ref[...],
                      preferred_element_type=jnp.float32) + be_ref[...]

        out_ref[...] = (h + emb).astype(out_ref.dtype)   # full 128-lane store

    return kernel


# ------------------------------- wrapper ------------------------------------

def _conv_im2col_weight(w_oihw, W, B):
    """3x3 OIHW conv weight -> one (3*B*W*Cin, B*W*Cout) bf16 matrix: Toeplitz
    band over W (horizontal taps + zero padding baked in), block-diagonal over
    the batch (batch lives on the lane axis), vertical taps stacked along K so
    the whole conv becomes a single MXU matmul against the im2col scratch."""
    cout, cin = int(w_oihw.shape[0]), int(w_oihw.shape[1])
    wt = jnp.transpose(w_oihw, (2, 3, 1, 0)).astype(jnp.float32)  # (3,3,Cin,Cout)
    eye_b = jnp.eye(B, dtype=jnp.float32)
    taps = []
    for dh in range(3):
        band = jnp.zeros((W * cin, W * cout), jnp.float32)
        for dw in range(3):
            for w in range(W):
                wi = w + dw - 1
                if 0 <= wi < W:
                    band = band.at[wi * cin:(wi + 1) * cin,
                                   w * cout:(w + 1) * cout].set(wt[dh, dw])
        taps.append(jnp.kron(eye_b, band))
    return jnp.concatenate(taps, axis=0).astype(jnp.bfloat16)


def _gn_affine(gamma, beta, reps):
    # per-channel affine tiled to the lane-fused (B*W*C) layout (c minor)
    return jnp.stack([jnp.tile(gamma.astype(jnp.float32), reps),
                      jnp.tile(beta.astype(jnp.float32), reps)])


def _same_sample_matrix(B, per_sample):
    # (L, L) 0/1 matrix: 1 iff both lanes belong to the same batch sample.
    grp = jnp.repeat(jnp.arange(B), per_sample)
    return (grp[:, None] == grp[None, :]).astype(jnp.float32)


def down(x_nchw, t_emb, params):
    """Forward of the PyTorch `Down` module.

    params = (w1, g1, b1, w2, g2, b2,   # DoubleConv(in, in, residual=True)
              w3, g3, b3, w4, g4, b4,   # DoubleConv(in, out)
              we, be)                   # emb Linear: (out, emb_dim), (out,)
    x is NCHW, conv weights are PyTorch OIHW, t_emb is (B, emb_dim).
    """
    (w1, g1, b1, w2, g2, b2, w3, g3, b3, w4, g4, b4, we, be) = params
    B, Cin, H0, W0 = map(int, x_nchw.shape)
    Cout = int(w4.shape[0])
    emb_dim = int(we.shape[1])
    H, W = H0 // 2, W0 // 2
    L1, L2 = B * W * Cin, B * W * Cout

    # ---- wrapper-side layout plumbing (pure XLA, once per call) ----
    # NCHW -> NHWC, 2x2 max-pool, then fold (B, W, C) onto the lane axis so
    # the kernel works on lane-dense (H, B*W*C) slabs (output lane width 128).
    # TODO(synk): at production resolutions fuse the pool/pad into the kernel
    # and tile spatially with a two-pass GroupNorm instead of whole-image
    # residency + O(W^2) Toeplitz weights.
    x = jnp.transpose(x_nchw, (0, 2, 3, 1)).astype(jnp.float32)
    pooled = x.reshape(B, H, 2, W, 2, Cin).max(axis=(2, 4))        # (B,H,W,Cin)
    x_lanes = jnp.transpose(pooled, (1, 0, 2, 3)).reshape(H, L1)   # (H, B*W*Cin)

    t1 = _conv_im2col_weight(w1, W, B)          # (3*L1, L1) bf16
    t2 = _conv_im2col_weight(w2, W, B)          # (3*L1, L1)
    t3 = _conv_im2col_weight(w3, W, B)          # (3*L1, L2)
    t4 = _conv_im2col_weight(w4, W, B)          # (3*L2, L2)
    gn1 = _gn_affine(g1, b1, B * W)             # (2, L1)
    gn2 = _gn_affine(g2, b2, B * W)
    gn3 = _gn_affine(g3, b3, B * W)             # (2, L2)
    gn4 = _gn_affine(g4, b4, B * W)
    sel1 = _same_sample_matrix(B, W * Cin)      # (L1, L1) f32
    sel2 = _same_sample_matrix(B, W * Cout)     # (L2, L2) f32
    we_big = jnp.kron(jnp.eye(B, dtype=jnp.float32),
                      jnp.tile(jnp.transpose(we).astype(jnp.float32), (1, W)))
    be_l = jnp.tile(be.astype(jnp.float32), B * W).reshape(1, L2)
    t_flat = t_emb.astype(jnp.float32).reshape(1, B * emb_dim)

    kernel = _make_down_kernel(B, H, W, Cin, Cout)
    inputs = (x_lanes, t_flat, t1, t2, t3, t4, gn1, gn2, gn3, gn4,
              sel1, sel2, we_big, be_l)

    out_flat = pl.pallas_call(
        kernel,
        out_shape=jax.ShapeDtypeStruct((H, L2), jnp.float32),
        grid_spec=pltpu.PrefetchScalarGridSpec(
            num_scalar_prefetch=0,
            grid=(1,),                           # whole problem in one step
            in_specs=[pl.BlockSpec(a.shape, lambda i: (0, 0)) for a in inputs],
            out_specs=pl.BlockSpec((H, L2), lambda i: (0, 0)),
            scratch_shapes=[
                pltpu.VMEM((H, 3 * L1), jnp.float32),   # im2col, Cin-lane convs
                pltpu.VMEM((H, 3 * L2), jnp.float32),   # im2col, Cout-lane conv
            ],
        ),
        compiler_params=pltpu.CompilerParams(
            dimension_semantics=("arbitrary",)),
    )(*inputs)

    out = out_flat.reshape(H, B, W, Cout)
    return jnp.transpose(out, (1, 3, 0, 2))      # back to NCHW


# --------------------------- pure-JAX reference -----------------------------

def ref_down(x_nchw, t_emb, params):
    (w1, g1, b1, w2, g2, b2, w3, g3, b3, w4, g4, b4, we, be) = params
    x = jnp.transpose(x_nchw, (0, 2, 3, 1)).astype(jnp.float32)
    B, H0, W0, C = x.shape
    x = x.reshape(B, H0 // 2, 2, W0 // 2, 2, C).max(axis=(2, 4))

    def conv(h, w_oihw):
        w = jnp.transpose(w_oihw, (2, 3, 1, 0)).astype(jnp.float32)
        return jax.lax.conv_general_dilated(
            h, w, (1, 1), "SAME", dimension_numbers=("NHWC", "HWIO", "NHWC"))

    def gn(h, g, b):
        mu = jnp.mean(h, axis=(1, 2, 3), keepdims=True)
        var = jnp.mean(jnp.square(h - mu), axis=(1, 2, 3), keepdims=True)
        return (h - mu) * jax.lax.rsqrt(var + 1e-5) * g + b

    gelu = lambda v: jax.nn.gelu(v, approximate=False)

    h = gelu(gn(conv(x, w1), g1, b1))
    h = gn(conv(h, w2), g2, b2)
    h = gelu(x + h)                          # DoubleConv(in, in, residual)

    h2 = gelu(gn(conv(h, w3), g3, b3))
    h2 = gn(conv(h2, w4), g4, b4)            # DoubleConv(in, out)

    emb = jax.nn.silu(t_emb.astype(jnp.float32)) @ we.T.astype(jnp.float32) \
        + be.astype(jnp.float32)
    out = h2 + emb[:, None, None, :]
    return jnp.transpose(out, (0, 3, 1, 2))


# --------------------------------- main --------------------------------------

if __name__ == "__main__":
    key = jax.random.PRNGKey(0)
    B, CIN, COUT, H0, W0 = 2, 4, 8, 16, 16
    EMB = 32                                 # emb_dim = SQ_SIZE * 4, SQ_SIZE = 8

    def make_params(k):
        ks = jax.random.split(k, 14)
        conv = lambda kk, ci, co: 0.3 * jax.random.normal(kk, (co, ci, 3, 3), jnp.float32)
        gam = lambda kk, c: 1.0 + 0.1 * jax.random.normal(kk, (c,), jnp.float32)
        bet = lambda kk, c: 0.1 * jax.random.normal(kk, (c,), jnp.float32)
        return (conv(ks[0], CIN, CIN), gam(ks[1], CIN), bet(ks[2], CIN),
                conv(ks[3], CIN, CIN), gam(ks[4], CIN), bet(ks[5], CIN),
                conv(ks[6], CIN, COUT), gam(ks[7], COUT), bet(ks[8], COUT),
                conv(ks[9], COUT, COUT), gam(ks[10], COUT), bet(ks[11], COUT),
                0.3 * jax.random.normal(ks[12], (COUT, EMB), jnp.float32),
                0.1 * jax.random.normal(ks[13], (COUT,), jnp.float32))

    kx, kt, kp = jax.random.split(key, 3)
    x = jax.random.normal(kx, (B, CIN, H0, W0), jnp.float32)
    t = jax.random.normal(kt, (B, EMB), jnp.float32)
    params = make_params(kp)

    out = jax.block_until_ready(down(x, t, params))
    ref = jax.block_until_ready(ref_down(x, t, params))
    assert out.shape == (B, COUT, H0 // 2, W0 // 2), out.shape
    err = float(jnp.max(jnp.abs(out - ref)))
    # bf16 MXU conv operands + approx-erf GELU + approx reciprocals vs. the
    # exact f32 reference -> relaxed tolerance (errors stay ~1% relative).
    assert err < 1.5e-1, f"max abs error {err}"
    print("KERNEL_OK")
</pallas_src>

<mosaic_0001>
module attributes {stable_mosaic.version = 11 : i64} {
  func.func @kernel(%arg0: i32, %arg1: memref<8x64xf32, #tpu.memory_space<vmem>>, %arg2: memref<1x64xf32, #tpu.memory_space<vmem>>, %arg3: memref<192x64xbf16, #tpu.memory_space<vmem>>, %arg4: memref<192x64xbf16, #tpu.memory_space<vmem>>, %arg5: memref<192x128xbf16, #tpu.memory_space<vmem>>, %arg6: memref<384x128xbf16, #tpu.memory_space<vmem>>, %arg7: memref<2x64xf32, #tpu.memory_space<vmem>>, %arg8: memref<2x64xf32, #tpu.memory_space<vmem>>, %arg9: memref<2x128xf32, #tpu.memory_space<vmem>>, %arg10: memref<2x128xf32, #tpu.memory_space<vmem>>, %arg11: memref<64x64xf32, #tpu.memory_space<vmem>>, %arg12: memref<128x128xf32, #tpu.memory_space<vmem>>, %arg13: memref<64x128xf32, #tpu.memory_space<vmem>>, %arg14: memref<1x128xf32, #tpu.memory_space<vmem>>, %arg15: memref<8x128xf32, #tpu.memory_space<vmem>>, %arg16: memref<8x192xf32, #tpu.memory_space<vmem>>, %arg17: memref<8x384xf32, #tpu.memory_space<vmem>>) attributes {dimension_semantics = [#tpu.dimension_semantics<arbitrary>], iteration_bounds = array<i64: 1>, scalar_prefetch = 0 : i64, scratch_operands = 2 : i64, tpu.core_type = #tpu.core_type<tc>, window_params = [{pipeline_mode = #tpu.pipeline_mode<synchronous>, transform_indices = @transform_0, window_bounds = array<i64: 8, 64>}, {pipeline_mode = #tpu.pipeline_mode<synchronous>, transform_indices = @transform_1, window_bounds = array<i64: 1, 64>}, {pipeline_mode = #tpu.pipeline_mode<synchronous>, transform_indices = @transform_2, window_bounds = array<i64: 192, 64>}, {pipeline_mode = #tpu.pipeline_mode<synchronous>, transform_indices = @transform_3, window_bounds = array<i64: 192, 64>}, {pipeline_mode = #tpu.pipeline_mode<synchronous>, transform_indices = @transform_4, window_bounds = array<i64: 192, 128>}, {pipeline_mode = #tpu.pipeline_mode<synchronous>, transform_indices = @transform_5, window_bounds = array<i64: 384, 128>}, {pipeline_mode = #tpu.pipeline_mode<synchronous>, transform_indices = @transform_6, window_bounds = array<i64: 2, 64>}, {pipeline_mode = #tpu.pipeline_mode<synchronous>, transform_indices = @transform_7, window_bounds = array<i64: 2, 64>}, {pipeline_mode = #tpu.pipeline_mode<synchronous>, transform_indices = @transform_8, window_bounds = array<i64: 2, 128>}, {pipeline_mode = #tpu.pipeline_mode<synchronous>, transform_indices = @transform_9, window_bounds = array<i64: 2, 128>}, {pipeline_mode = #tpu.pipeline_mode<synchronous>, transform_indices = @transform_10, window_bounds = array<i64: 64, 64>}, {pipeline_mode = #tpu.pipeline_mode<synchronous>, transform_indices = @transform_11, window_bounds = array<i64: 128, 128>}, {pipeline_mode = #tpu.pipeline_mode<synchronous>, transform_indices = @transform_12, window_bounds = array<i64: 64, 128>}, {pipeline_mode = #tpu.pipeline_mode<synchronous>, transform_indices = @transform_13, window_bounds = array<i64: 1, 128>}, {pipeline_mode = #tpu.pipeline_mode<synchronous>, transform_indices = @transform_14, window_bounds = array<i64: 8, 128>}]} {
    %cst = arith.constant 0.000000e+00 : f32
    %0 = vector.broadcast %cst : f32 to vector<8x192xf32>
    %c0 = arith.constant 0 : index
    %c0_0 = arith.constant 0 : index
    %1 = vector.load %arg16[%c0, %c0_0] : memref<8x192xf32, #tpu.memory_space<vmem>>, vector<8x192xf32>
    tpu.vector_store %arg16[%c0, %c0_0], %0 {strides = array<i32>} : memref<8x192xf32, #tpu.memory_space<vmem>>, vector<8x192xf32>,
    %cst_1 = arith.constant 0.000000e+00 : f32
    %2 = vector.broadcast %cst_1 : f32 to vector<8x384xf32>
    %c0_2 = arith.constant 0 : index
    %c0_3 = arith.constant 0 : index
    %3 = vector.load %arg17[%c0_2, %c0_3] : memref<8x384xf32, #tpu.memory_space<vmem>>, vector<8x384xf32>
    tpu.vector_store %arg17[%c0_2, %c0_3], %2 {strides = array<i32>} : memref<8x384xf32, #tpu.memory_space<vmem>>, vector<8x384xf32>,
    %c0_4 = arith.constant 0 : index
    %c0_5 = arith.constant 0 : index
    %4 = vector.load %arg1[%c0_4, %c0_5] : memref<8x64xf32, #tpu.memory_space<vmem>>, vector<8x64xf32>
    %5 = vector.extract_strided_slice %4 {offsets = [0, 0], sizes = [7, 64], strides = [1, 1]} : vector<8x64xf32> to vector<7x64xf32>
    %c1 = arith.constant 1 : index
    %c0_6 = arith.constant 0 : index
    %6 = vector.load %arg16[%c1, %c0_6] : memref<8x192xf32, #tpu.memory_space<vmem>>, vector<7x64xf32>
    tpu.vector_store %arg16[%c1, %c0_6], %5 {strides = array<i32>} : memref<8x192xf32, #tpu.memory_space<vmem>>, vector<7x64xf32>,
    %c0_7 = arith.constant 0 : index
    %c64 = arith.constant 64 : index
    %7 = vector.load %arg16[%c0_7, %c64] : memref<8x192xf32, #tpu.memory_space<vmem>>, vector<8x64xf32>
    tpu.vector_store %arg16[%c0_7, %c64], %4 {strides = array<i32>} : memref<8x192xf32, #tpu.memory_space<vmem>>, vector<8x64xf32>,
    %8 = vector.extract_strided_slice %4 {offsets = [1, 0], sizes = [7, 64], strides = [1, 1]} : vector<8x64xf32> to vector<7x64xf32>
    %c0_8 = arith.constant 0 : index
    %c128 = arith.constant 128 : index
    %9 = vector.load %arg16[%c0_8, %c128] : memref<8x192xf32, #tpu.memory_space<vmem>>, vector<7x64xf32>
    tpu.vector_store %arg16[%c0_8, %c128], %8 {strides = array<i32>} : memref<8x192xf32, #tpu.memory_space<vmem>>, vector<7x64xf32>,
    %c0_9 = arith.constant 0 : index
    %c0_10 = arith.constant 0 : index
    %10 = vector.load %arg16[%c0_9, %c0_10] : memref<8x192xf32, #tpu.memory_space<vmem>>, vector<8x192xf32>
    %11 = arith.truncf %10 : vector<8x192xf32> to vector<8x192xbf16>
    %c0_11 = arith.constant 0 : index
    %c0_12 = arith.constant 0 : index
    %12 = vector.load %arg3[%c0_11, %c0_12] : memref<192x64xbf16, #tpu.memory_space<vmem>>, vector<192x64xbf16>
    %cst_13 = arith.constant dense<0.000000e+00> : vector<8x64xf32>
    %13 = tpu.matmul %11, %12, %cst_13 {dimension_numbers = #tpu.dot_dimension_numbers<[1], [0], [0], [1], [0, 0, 1, 1], [], []>} : vector<8x192xbf16>, vector<192x64xbf16>, vector<8x64xf32> -> vector<8x64xf32>
    %cst_14 = arith.constant dense<0.000000e+00> : vector<64xf32>
    %14 = vector.multi_reduction <add>, %13, %cst_14 [0] : vector<8x64xf32> to vector<64xf32>
    %15 = vector.shape_cast %14 : vector<64xf32> to vector<1x64xf32>
    %16 = arith.mulf %13, %13 : vector<8x64xf32>
    %cst_15 = arith.constant dense<0.000000e+00> : vector<64xf32>
    %17 = vector.multi_reduction <add>, %16, %cst_15 [0] : vector<8x64xf32> to vector<64xf32>
    %18 = vector.shape_cast %17 : vector<64xf32> to vector<1x64xf32>
    %19 = tpu.concatenate %15, %18 in 0 : vector<1x64xf32>, vector<1x64xf32> -> vector<2x64xf32>
    %c0_16 = arith.constant 0 : index
    %c0_17 = arith.constant 0 : index
    %20 = vector.load %arg11[%c0_16, %c0_17] : memref<64x64xf32, #tpu.memory_space<vmem>>, vector<64x64xf32>
    %cst_18 = arith.constant dense<0.000000e+00> : vector<2x64xf32>
    %21 = tpu.matmul %19, %20, %cst_18 {dimension_numbers = #tpu.dot_dimension_numbers<[1], [0], [0], [1], [0, 0, 1, 1], [], []>} : vector<2x64xf32>, vector<64x64xf32>, vector<2x64xf32> -> vector<2x64xf32>
    %22 = vector.extract_strided_slice %21 {offsets = [0, 0], sizes = [1, 64], strides = [1, 1]} : vector<2x64xf32> to vector<1x64xf32>
    %cst_19 = arith.constant 3.906250e-03 : f32
    %23 = vector.broadcast %cst_19 : f32 to vector<1x64xf32>
    %24 = arith.mulf %22, %23 : vector<1x64xf32>
    %25 = vector.extract_strided_slice %21 {offsets = [1, 0], sizes = [1, 64], strides = [1, 1]} : vector<2x64xf32> to vector<1x64xf32>
    %cst_20 = arith.constant 3.906250e-03 : f32
    %26 = vector.broadcast %cst_20 : f32 to vector<1x64xf32>
    %27 = arith.mulf %25, %26 : vector<1x64xf32>
    %28 = arith.mulf %24, %24 : vector<1x64xf32>
    %29 = arith.subf %27, %28 : vector<1x64xf32>
    %cst_21 = arith.constant 9.99999974E-6 : f32
    %30 = vector.broadcast %cst_21 : f32 to vector<1x64xf32>
    %31 = arith.addf %29, %30 : vector<1x64xf32>
    %32 = math.rsqrt %31 : vector<1x64xf32>
    %c0_22 = arith.constant 0 : index
    %c0_23 = arith.constant 0 : index
    %33 = vector.load %arg7[%c0_22, %c0_23] : memref<2x64xf32, #tpu.memory_space<vmem>>, vector<1x64xf32>
    %34 = arith.mulf %32, %33 : vector<1x64xf32>
    %c1_24 = arith.constant 1 : index
    %c0_25 = arith.constant 0 : index
    %35 = vector.load %arg7[%c1_24, %c0_25] : memref<2x64xf32, #tpu.memory_space<vmem>>, vector<1x64xf32>
    %36 = arith.mulf %24, %34 : vector<1x64xf32>
    %37 = arith.subf %35, %36 : vector<1x64xf32>
    %38 = vector.broadcast %34 : vector<1x64xf32> to vector<8x64xf32>
    %39 = arith.mulf %13, %38 : vector<8x64xf32>
    %40 = vector.broadcast %37 : vector<1x64xf32> to vector<8x64xf32>
    %41 = arith.addf %39, %40 : vector<8x64xf32>
    %cst_26 = arith.constant 0.707106769 : f32
    %42 = vector.broadcast %cst_26 : f32 to vector<8x64xf32>
    %43 = arith.mulf %41, %42 : vector<8x64xf32>
    %44 = math.absf %43 : vector<8x64xf32>
    %cst_27 = arith.constant 0.327591091 : f32
    %45 = vector.broadcast %cst_27 : f32 to vector<8x64xf32>
    %46 = arith.mulf %45, %44 : vector<8x64xf32>
    %cst_28 = arith.constant 1.000000e+00 : f32
    %47 = vector.broadcast %cst_28 : f32 to vector<8x64xf32>
    %48 = arith.addf %47, %46 : vector<8x64xf32>
    %49 = tpu.reciprocal %48 {approx = true} : vector<8x64xf32> -> vector<8x64xf32>
    %cst_29 = arith.constant 1.06140542 : f32
    %50 = vector.broadcast %cst_29 : f32 to vector<8x64xf32>
    %51 = arith.mulf %50, %49 : vector<8x64xf32>
    %cst_30 = arith.constant -1.45315206 : f32
    %52 = vector.broadcast %cst_30 : f32 to vector<8x64xf32>
    %53 = arith.addf %51, %52 : vector<8x64xf32>
    %54 = arith.mulf %53, %49 : vector<8x64xf32>
    %cst_31 = arith.constant 1.42141378 : f32
    %55 = vector.broadcast %cst_31 : f32 to vector<8x64xf32>
    %56 = arith.addf %54, %55 : vector<8x64xf32>
    %57 = arith.mulf %56, %49 : vector<8x64xf32>
    %cst_32 = arith.constant -0.284496725 : f32
    %58 = vector.broadcast %cst_32 : f32 to vector<8x64xf32>
    %59 = arith.addf %57, %58 : vector<8x64xf32>
    %60 = arith.mulf %59, %49 : vector<8x64xf32>
    %cst_33 = arith.constant 0.254829586 : f32
    %61 = vector.broadcast %cst_33 : f32 to vector<8x64xf32>
    %62 = arith.addf %60, %61 : vector<8x64xf32>
    %63 = arith.mulf %62, %49 : vector<8x64xf32>
    %cst_34 = arith.constant 0.000000e+00 : f32
    %64 = vector.broadcast %cst_34 : f32 to vector<8x64xf32>
    %65 = arith.subf %64, %44 : vector<8x64xf32>
    %66 = arith.mulf %65, %44 : vector<8x64xf32>
    %67 = math.exp %66 : vector<8x64xf32>
    %68 = arith.mulf %63, %67 : vector<8x64xf32>
    %cst_35 = arith.constant 1.000000e+00 : f32
    %69 = vector.broadcast %cst_35 : f32 to vector<8x64xf32>
    %70 = arith.subf %69, %68 : vector<8x64xf32>
    %cst_36 = arith.constant 0.000000e+00 : f32
    %71 = vector.broadcast %cst_36 : f32 to vector<8x64xf32>
    %72 = arith.cmpf olt, %43, %71 : vector<8x64xf32>
    %cst_37 = arith.constant 0.000000e+00 : f32
    %73 = vector.broadcast %cst_37 : f32 to vector<8x64xf32>
    %74 = arith.subf %73, %70 : vector<8x64xf32>
    %75 = arith.select %72, %74, %70 : vector<8x64xi1>, vector<8x64xf32>
    %cst_38 = arith.constant 5.000000e-01 : f32
    %76 = vector.broadcast %cst_38 : f32 to vector<8x64xf32>
    %77 = arith.mulf %76, %41 : vector<8x64xf32>
    %cst_39 = arith.constant 1.000000e+00 : f32
    %78 = vector.broadcast %cst_39 : f32 to vector<8x64xf32>
    %79 = arith.addf %78, %75 : vector<8x64xf32>
    %80 = arith.mulf %77, %79 : vector<8x64xf32>
    %81 = vector.extract_strided_slice %80 {offsets = [0, 0], sizes = [7, 64], strides = [1, 1]} : vector<8x64xf32> to vector<7x64xf32>
    %c1_40 = arith.constant 1 : index
    %c0_41 = arith.constant 0 : index
    %82 = vector.load %arg16[%c1_40, %c0_41] : memref<8x192xf32, #tpu.memory_space<vmem>>, vector<7x64xf32>
    tpu.vector_store %arg16[%c1_40, %c0_41], %81 {strides = array<i32>} : memref<8x192xf32, #tpu.memory_space<vmem>>, vector<7x64xf32>,
    %c0_42 = arith.constant 0 : index
    %c64_43 = arith.constant 64 : index
    %83 = vector.load %arg16[%c0_42, %c64_43] : memref<8x192xf32, #tpu.memory_space<vmem>>, vector<8x64xf32>
    tpu.vector_store %arg16[%c0_42, %c64_43], %80 {strides = array<i32>} : memref<8x192xf32, #tpu.memory_space<vmem>>, vector<8x64xf32>,
    %84 = vector.extract_strided_slice %80 {offsets = [1, 0], sizes = [7, 64], strides = [1, 1]} : vector<8x64xf32> to vector<7x64xf32>
    %c0_44 = arith.constant 0 : index
    %c128_45 = arith.constant 128 : index
    %85 = vector.load %arg16[%c0_44, %c128_45] : memref<8x192xf32, #tpu.memory_space<vmem>>, vector<7x64xf32>
    tpu.vector_store %arg16[%c0_44, %c128_45], %84 {strides = array<i32>} : memref<8x192xf32, #tpu.memory_space<vmem>>, vector<7x64xf32>,
    %c0_46 = arith.constant 0 : index
    %c0_47 = arith.constant 0 : index
    %86 = vector.load %arg16[%c0_46, %c0_47] : memref<8x192xf32, #tpu.memory_space<vmem>>, vector<8x192xf32>
    %87 = arith.truncf %86 : vector<8x192xf32> to vector<8x192xbf16>
    %c0_48 = arith.constant 0 : index
    %c0_49 = arith.constant 0 : index
    %88 = vector.load %arg4[%c0_48, %c0_49] : memref<192x64xbf16, #tpu.memory_space<vmem>>, vector<192x64xbf16>
    %cst_50 = arith.constant dense<0.000000e+00> : vector<8x64xf32>
    %89 = tpu.matmul %87, %88, %cst_50 {dimension_numbers = #tpu.dot_dimension_numbers<[1], [0], [0], [1], [0, 0, 1, 1], [], []>} : vector<8x192xbf16>, vector<192x64xbf16>, vector<8x64xf32> -> vector<8x64xf32>
    %cst_51 = arith.constant dense<0.000000e+00> : vector<64xf32>
    %90 = vector.multi_reduction <add>, %89, %cst_51 [0] : vector<8x64xf32> to vector<64xf32>
    %91 = vector.shape_cast %90 : vector<64xf32> to vector<1x64xf32>
    %92 = arith.mulf %89, %89 : vector<8x64xf32>
    %cst_52 = arith.constant dense<0.000000e+00> : vector<64xf32>
    %93 = vector.multi_reduction <add>, %92, %cst_52 [0] : vector<8x64xf32> to vector<64xf32>
    %94 = vector.shape_cast %93 : vector<64xf32> to vector<1x64xf32>
    %95 = tpu.concatenate %91, %94 in 0 : vector<1x64xf32>, vector<1x64xf32> -> vector<2x64xf32>
    %c0_53 = arith.constant 0 : index
    %c0_54 = arith.constant 0 : index
    %96 = vector.load %arg11[%c0_53, %c0_54] : memref<64x64xf32, #tpu.memory_space<vmem>>, vector<64x64xf32>
    %cst_55 = arith.constant dense<0.000000e+00> : vector<2x64xf32>
    %97 = tpu.matmul %95, %96, %cst_55 {dimension_numbers = #tpu.dot_dimension_numbers<[1], [0], [0], [1], [0, 0, 1, 1], [], []>} : vector<2x64xf32>, vector<64x64xf32>, vector<2x64xf32> -> vector<2x64xf32>
    %98 = vector.extract_strided_slice %97 {offsets = [0, 0], sizes = [1, 64], strides = [1, 1]} : vector<2x64xf32> to vector<1x64xf32>
    %cst_56 = arith.constant 3.906250e-03 : f32
    %99 = vector.broadcast %cst_56 : f32 to vector<1x64xf32>
    %100 = arith.mulf %98, %99 : vector<1x64xf32>
    %101 = vector.extract_strided_slice %97 {offsets = [1, 0], sizes = [1, 64], strides = [1, 1]} : vector<2x64xf32> to vector<1x64xf32>
    %cst_57 = arith.constant 3.906250e-03 : f32
    %102 = vector.broadcast %cst_57 : f32 to vector<1x64xf32>
    %103 = arith.mulf %101, %102 : vector<1x64xf32>
    %104 = arith.mulf %100, %100 : vector<1x64xf32>
    %105 = arith.subf %103, %104 : vector<1x64xf32>
    %cst_58 = arith.constant 9.99999974E-6 : f32
    %106 = vector.broadcast %cst_58 : f32 to vector<1x64xf32>
    %107 = arith.addf %105, %106 : vector<1x64xf32>
    %108 = math.rsqrt %107 : vector<1x64xf32>
    %c0_59 = arith.constant 0 : index
    %c0_60 = arith.constant 0 : index
    %109 = vector.load %arg8[%c0_59, %c0_60] : memref<2x64xf32, #tpu.memory_space<vmem>>, vector<1x64xf32>
    %110 = arith.mulf %108, %109 : vector<1x64xf32>
    %c1_61 = arith.constant 1 : index
    %c0_62 = arith.constant 0 : index
    %111 = vector.load %arg8[%c1_61, %c0_62] : memref<2x64xf32, #tpu.memory_space<vmem>>, vector<1x64xf32>
    %112 = arith.mulf %100, %110 : vector<1x64xf32>
    %113 = arith.subf %111, %112 : vector<1x64xf32>
    %114 = vector.broadcast %110 : vector<1x64xf32> to vector<8x64xf32>
    %115 = arith.mulf %89, %114 : vector<8x64xf32>
    %116 = vector.broadcast %113 : vector<1x64xf32> to vector<8x64xf32>
    %117 = arith.addf %115, %116 : vector<8x64xf32>
    %118 = arith.addf %4, %117 : vector<8x64xf32>
    %cst_63 = arith.constant 0.707106769 : f32
    %119 = vector.broadcast %cst_63 : f32 to vector<8x64xf32>
    %120 = arith.mulf %118, %119 : vector<8x64xf32>
    %121 = math.absf %120 : vector<8x64xf32>
    %cst_64 = arith.constant 0.327591091 : f32
    %122 = vector.broadcast %cst_64 : f32 to vector<8x64xf32>
    %123 = arith.mulf %122, %121 : vector<8x64xf32>
    %cst_65 = arith.constant 1.000000e+00 : f32
    %124 = vector.broadcast %cst_65 : f32 to vector<8x64xf32>
    %125 = arith.addf %124, %123 : vector<8x64xf32>
    %126 = tpu.reciprocal %125 {approx = true} : vector<8x64xf32> -> vector<8x64xf32>
    %cst_66 = arith.constant 1.06140542 : f32
    %127 = vector.broadcast %cst_66 : f32 to vector<8x64xf32>
    %128 = arith.mulf %127, %126 : vector<8x64xf32>
    %cst_67 = arith.constant -1.45315206 : f32
    %129 = vector.broadcast %cst_67 : f32 to vector<8x64xf32>
    %130 = arith.addf %128, %129 : vector<8x64xf32>
    %131 = arith.mulf %130, %126 : vector<8x64xf32>
    %cst_68 = arith.constant 1.42141378 : f32
    %132 = vector.broadcast %cst_68 : f32 to vector<8x64xf32>
    %133 = arith.addf %131, %132 : vector<8x64xf32>
    %134 = arith.mulf %133, %126 : vector<8x64xf32>
    %cst_69 = arith.constant -0.284496725 : f32
    %135 = vector.broadcast %cst_69 : f32 to vector<8x64xf32>
    %136 = arith.addf %134, %135 : vector<8x64xf32>
    %137 = arith.mulf %136, %126 : vector<8x64xf32>
    %cst_70 = arith.constant 0.254829586 : f32
    %138 = vector.broadcast %cst_70 : f32 to vector<8x64xf32>
    %139 = arith.addf %137, %138 : vector<8x64xf32>
    %140 = arith.mulf %139, %126 : vector<8x64xf32>
    %cst_71 = arith.constant 0.000000e+00 : f32
    %141 = vector.broadcast %cst_71 : f32 to vector<8x64xf32>
    %142 = arith.subf %141, %121 : vector<8x64xf32>
    %143 = arith.mulf %142, %121 : vector<8x64xf32>
    %144 = math.exp %143 : vector<8x64xf32>
    %145 = arith.mulf %140, %144 : vector<8x64xf32>
    %cst_72 = arith.constant 1.000000e+00 : f32
    %146 = vector.broadcast %cst_72 : f32 to vector<8x64xf32>
    %147 = arith.subf %146, %145 : vector<8x64xf32>
    %cst_73 = arith.constant 0.000000e+00 : f32
    %148 = vector.broadcast %cst_73 : f32 to vector<8x64xf32>
    %149 = arith.cmpf olt, %120, %148 : vector<8x64xf32>
    %cst_74 = arith.constant 0.000000e+00 : f32
    %150 = vector.broadcast %cst_74 : f32 to vector<8x64xf32>
    %151 = arith.subf %150, %147 : vector<8x64xf32>
    %152 = arith.select %149, %151, %147 : vector<8x64xi1>, vector<8x64xf32>
    %cst_75 = arith.constant 5.000000e-01 : f32
    %153 = vector.broadcast %cst_75 : f32 to vector<8x64xf32>
    %154 = arith.mulf %153, %118 : vector<8x64xf32>
    %cst_76 = arith.constant 1.000000e+00 : f32
    %155 = vector.broadcast %cst_76 : f32 to vector<8x64xf32>
    %156 = arith.addf %155, %152 : vector<8x64xf32>
    %157 = arith.mulf %154, %156 : vector<8x64xf32>
    %158 = vector.extract_strided_slice %157 {offsets = [0, 0], sizes = [7, 64], strides = [1, 1]} : vector<8x64xf32> to vector<7x64xf32>
    %c1_77 = arith.constant 1 : index
    %c0_78 = arith.constant 0 : index
    %159 = vector.load %arg16[%c1_77, %c0_78] : memref<8x192xf32, #tpu.memory_space<vmem>>, vector<7x64xf32>
    tpu.vector_store %arg16[%c1_77, %c0_78], %158 {strides = array<i32>} : memref<8x192xf32, #tpu.memory_space<vmem>>, vector<7x64xf32>,
    %c0_79 = arith.constant 0 : index
    %c64_80 = arith.constant 64 : index
    %160 = vector.load %arg16[%c0_79, %c64_80] : memref<8x192xf32, #tpu.memory_space<vmem>>, vector<8x64xf32>
    tpu.vector_store %arg16[%c0_79, %c64_80], %157 {strides = array<i32>} : memref<8x192xf32, #tpu.memory_space<vmem>>, vector<8x64xf32>,
    %161 = vector.extract_strided_slice %157 {offsets = [1, 0], sizes = [7, 64], strides = [1, 1]} : vector<8x64xf32> to vector<7x64xf32>
    %c0_81 = arith.constant 0 : index
    %c128_82 = arith.constant 128 : index
    %162 = vector.load %arg16[%c0_81, %c128_82] : memref<8x192xf32, #tpu.memory_space<vmem>>, vector<7x64xf32>
    tpu.vector_store %arg16[%c0_81, %c128_82], %161 {strides = array<i32>} : memref<8x192xf32, #tpu.memory_space<vmem>>, vector<7x64xf32>,
    %c0_83 = arith.constant 0 : index
    %c0_84 = arith.constant 0 : index
    %163 = vector.load %arg16[%c0_83, %c0_84] : memref<8x192xf32, #tpu.memory_space<vmem>>, vector<8x192xf32>
    %164 = arith.truncf %163 : vector<8x192xf32> to vector<8x192xbf16>
    %c0_85 = arith.constant 0 : index
    %c0_86 = arith.constant 0 : index
    %165 = vector.load %arg5[%c0_85, %c0_86] : memref<192x128xbf16, #tpu.memory_space<vmem>>, vector<192x128xbf16>
    %cst_87 = arith.constant dense<0.000000e+00> : vector<8x128xf32>
    %166 = tpu.matmul %164, %165, %cst_87 {dimension_numbers = #tpu.dot_dimension_numbers<[1], [0], [0], [1], [0, 0, 1, 1], [], []>} : vector<8x192xbf16>, vector<192x128xbf16>, vector<8x128xf32> -> vector<8x128xf32>
    %cst_88 = arith.constant dense<0.000000e+00> : vector<128xf32>
    %167 = vector.multi_reduction <add>, %166, %cst_88 [0] : vector<8x128xf32> to vector<128xf32>
    %168 = vector.shape_cast %167 : vector<128xf32> to vector<1x128xf32>
    %169 = arith.mulf %166, %166 : vector<8x128xf32>
    %cst_89 = arith.constant dense<0.000000e+00> : vector<128xf32>
    %170 = vector.multi_reduction <add>, %169, %cst_89 [0] : vector<8x128xf32> to vector<128xf32>
    %171 = vector.shape_cast %170 : vector<128xf32> to vector<1x128xf32>
    %172 = tpu.concatenate %168, %171 in 0 : vector<1x128xf32>, vector<1x128xf32> -> vector<2x128xf32>
    %c0_90 = arith.constant 0 : index
    %c0_91 = arith.constant 0 : index
    %173 = vector.load %arg12[%c0_90, %c0_91] : memref<128x128xf32, #tpu.memory_space<vmem>>, vector<128x128xf32>
    %cst_92 = arith.constant dense<0.000000e+00> : vector<2x128xf32>
    %174 = tpu.matmul %172, %173, %cst_92 {dimension_numbers = #tpu.dot_dimension_numbers<[1], [0], [0], [1], [0, 0, 1, 1], [], []>} : vector<2x128xf32>, vector<128x128xf32>, vector<2x128xf32> -> vector<2x128xf32>
    %175 = vector.extract_strided_slice %174 {offsets = [0, 0], sizes = [1, 128], strides = [1, 1]} : vector<2x128xf32> to vector<1x128xf32>
    %cst_93 = arith.constant 0.001953125 : f32
    %176 = vector.broadcast %cst_93 : f32 to vector<1x128xf32>
    %177 = arith.mulf %175, %176 : vector<1x128xf32>
    %178 = vector.extract_strided_slice %174 {offsets = [1, 0], sizes = [1, 128], strides = [1, 1]} : vector<2x128xf32> to vector<1x128xf32>
    %cst_94 = arith.constant 0.001953125 : f32
    %179 = vector.broadcast %cst_94 : f32 to vector<1x128xf32>
    %180 = arith.mulf %178, %179 : vector<1x128xf32>
    %181 = arith.mulf %177, %177 : vector<1x128xf32>
    %182 = arith.subf %180, %181 : vector<1x128xf32>
    %cst_95 = arith.constant 9.99999974E-6 : f32
    %183 = vector.broadcast %cst_95 : f32 to vector<1x128xf32>
    %184 = arith.addf %182, %183 : vector<1x128xf32>
    %185 = math.rsqrt %184 : vector<1x128xf32>
    %c0_96 = arith.constant 0 : index
    %c0_97 = arith.constant 0 : index
    %186 = vector.load %arg9[%c0_96, %c0_97] : memref<2x128xf32, #tpu.memory_space<vmem>>, vector<1x128xf32>
    %187 = arith.mulf %185, %186 : vector<1x128xf32>
    %c1_98 = arith.constant 1 : index
    %c0_99 = arith.constant 0 : index
    %188 = vector.load %arg9[%c1_98, %c0_99] : memref<2x128xf32, #tpu.memory_space<vmem>>, vector<1x128xf32>
    %189 = arith.mulf %177, %187 : vector<1x128xf32>
    %190 = arith.subf %188, %189 : vector<1x128xf32>
    %191 = vector.broadcast %187 : vector<1x128xf32> to vector<8x128xf32>
    %192 = arith.mulf %166, %191 : vector<8x128xf32>
    %193 = vector.broadcast %190 : vector<1x128xf32> to vector<8x128xf32>
    %194 = arith.addf %192, %193 : vector<8x128xf32>
    %cst_100 = arith.constant 0.707106769 : f32
    %195 = vector.broadcast %cst_100 : f32 to vector<8x128xf32>
    %196 = arith.mulf %194, %195 : vector<8x128xf32>
    %197 = math.absf %196 : vector<8x128xf32>
    %cst_101 = arith.constant 0.327591091 : f32
    %198 = vector.broadcast %cst_101 : f32 to vector<8x128xf32>
    %199 = arith.mulf %198, %197 : vector<8x128xf32>
    %cst_102 = arith.constant 1.000000e+00 : f32
    %200 = vector.broadcast %cst_102 : f32 to vector<8x128xf32>
    %201 = arith.addf %200, %199 : vector<8x128xf32>
    %202 = tpu.reciprocal %201 {approx = true} : vector<8x128xf32> -> vector<8x128xf32>
    %cst_103 = arith.constant 1.06140542 : f32
    %203 = vector.broadcast %cst_103 : f32 to vector<8x128xf32>
    %204 = arith.mulf %203, %202 : vector<8x128xf32>
    %cst_104 = arith.constant -1.45315206 : f32
    %205 = vector.broadcast %cst_104 : f32 to vector<8x128xf32>
    %206 = arith.addf %204, %205 : vector<8x128xf32>
    %207 = arith.mulf %206, %202 : vector<8x128xf32>
    %cst_105 = arith.constant 1.42141378 : f32
    %208 = vector.broadcast %cst_105 : f32 to vector<8x128xf32>
    %209 = arith.addf %207, %208 : vector<8x128xf32>
    %210 = arith.mulf %209, %202 : vector<8x128xf32>
    %cst_106 = arith.constant -0.284496725 : f32
    %211 = vector.broadcast %cst_106 : f32 to vector<8x128xf32>
    %212 = arith.addf %210, %211 : vector<8x128xf32>
    %213 = arith.mulf %212, %202 : vector<8x128xf32>
    %cst_107 = arith.constant 0.254829586 : f32
    %214 = vector.broadcast %cst_107 : f32 to vector<8x128xf32>
    %215 = arith.addf %213, %214 : vector<8x128xf32>
    %216 = arith.mulf %215, %202 : vector<8x128xf32>
    %cst_108 = arith.constant 0.000000e+00 : f32
    %217 = vector.broadcast %cst_108 : f32 to vector<8x128xf32>
    %218 = arith.subf %217, %197 : vector<8x128xf32>
    %219 = arith.mulf %218, %197 : vector<8x128xf32>
    %220 = math.exp %219 : vector<8x128xf32>
    %221 = arith.mulf %216, %220 : vector<8x128xf32>
    %cst_109 = arith.constant 1.000000e+00 : f32
    %222 = vector.broadcast %cst_109 : f32 to vector<8x128xf32>
    %223 = arith.subf %222, %221 : vector<8x128xf32>
    %cst_110 = arith.constant 0.000000e+00 : f32
    %224 = vector.broadcast %cst_110 : f32 to vector<8x128xf32>
    %225 = arith.cmpf olt, %196, %224 : vector<8x128xf32>
    %cst_111 = arith.constant 0.000000e+00 : f32
    %226 = vector.broadcast %cst_111 : f32 to vector<8x128xf32>
    %227 = arith.subf %226, %223 : vector<8x128xf32>
    %228 = arith.select %225, %227, %223 : vector<8x128xi1>, vector<8x128xf32>
    %cst_112 = arith.constant 5.000000e-01 : f32
    %229 = vector.broadcast %cst_112 : f32 to vector<8x128xf32>
    %230 = arith.mulf %229, %194 : vector<8x128xf32>
    %cst_113 = arith.constant 1.000000e+00 : f32
    %231 = vector.broadcast %cst_113 : f32 to vector<8x128xf32>
    %232 = arith.addf %231, %228 : vector<8x128xf32>
    %233 = arith.mulf %230, %232 : vector<8x128xf32>
    %234 = vector.extract_strided_slice %233 {offsets = [0, 0], sizes = [7, 128], strides = [1, 1]} : vector<8x128xf32> to vector<7x128xf32>
    %c1_114 = arith.constant 1 : index
    %c0_115 = arith.constant 0 : index
    %235 = vector.load %arg17[%c1_114, %c0_115] : memref<8x384xf32, #tpu.memory_space<vmem>>, vector<7x128xf32>
    tpu.vector_store %arg17[%c1_114, %c0_115], %234 {strides = array<i32>} : memref<8x384xf32, #tpu.memory_space<vmem>>, vector<7x128xf32>,
    %c0_116 = arith.constant 0 : index
    %c128_117 = arith.constant 128 : index
    %236 = vector.load %arg17[%c0_116, %c128_117] : memref<8x384xf32, #tpu.memory_space<vmem>>, vector<8x128xf32>
    tpu.vector_store %arg17[%c0_116, %c128_117], %233 {strides = array<i32>} : memref<8x384xf32, #tpu.memory_space<vmem>>, vector<8x128xf32>,
    %237 = vector.extract_strided_slice %233 {offsets = [1, 0], sizes = [7, 128], strides = [1, 1]} : vector<8x128xf32> to vector<7x128xf32>
    %c0_118 = arith.constant 0 : index
    %c256 = arith.constant 256 : index
    %238 = vector.load %arg17[%c0_118, %c256] : memref<8x384xf32, #tpu.memory_space<vmem>>, vector<7x128xf32>
    tpu.vector_store %arg17[%c0_118, %c256], %237 {strides = array<i32>} : memref<8x384xf32, #tpu.memory_space<vmem>>, vector<7x128xf32>,
    %c0_119 = arith.constant 0 : index
    %c0_120 = arith.constant 0 : index
    %239 = vector.load %arg17[%c0_119, %c0_120] : memref<8x384xf32, #tpu.memory_space<vmem>>, vector<8x384xf32>
    %240 = arith.truncf %239 : vector<8x384xf32> to vector<8x384xbf16>
    %c0_121 = arith.constant 0 : index
    %c0_122 = arith.constant 0 : index
    %241 = vector.load %arg6[%c0_121, %c0_122] : memref<384x128xbf16, #tpu.memory_space<vmem>>, vector<384x128xbf16>
    %cst_123 = arith.constant dense<0.000000e+00> : vector<8x128xf32>
    %242 = tpu.matmul %240, %241, %cst_123 {dimension_numbers = #tpu.dot_dimension_numbers<[1], [0], [0], [1], [0, 0, 1, 1], [], []>} : vector<8x384xbf16>, vector<384x128xbf16>, vector<8x128xf32> -> vector<8x128xf32>
    %cst_124 = arith.constant dense<0.000000e+00> : vector<128xf32>
    %243 = vector.multi_reduction <add>, %242, %cst_124 [0] : vector<8x128xf32> to vector<128xf32>
    %244 = vector.shape_cast %243 : vector<128xf32> to vector<1x128xf32>
    %245 = arith.mulf %242, %242 : vector<8x128xf32>
    %cst_125 = arith.constant dense<0.000000e+00> : vector<128xf32>
    %246 = vector.multi_reduction <add>, %245, %cst_125 [0] : vector<8x128xf32> to vector<128xf32>
    %247 = vector.shape_cast %246 : vector<128xf32> to vector<1x128xf32>
    %248 = tpu.concatenate %244, %247 in 0 : vector<1x128xf32>, vector<1x128xf32> -> vector<2x128xf32>
    %c0_126 = arith.constant 0 : index
    %c0_127 = arith.constant 0 : index
    %249 = vector.load %arg12[%c0_126, %c0_127] : memref<128x128xf32, #tpu.memory_space<vmem>>, vector<128x128xf32>
    %cst_128 = arith.constant dense<0.000000e+00> : vector<2x128xf32>
    %250 = tpu.matmul %248, %249, %cst_128 {dimension_numbers = #tpu.dot_dimension_numbers<[1], [0], [0], [1], [0, 0, 1, 1], [], []>} : vector<2x128xf32>, vector<128x128xf32>, vector<2x128xf32> -> vector<2x128xf32>
    %251 = vector.extract_strided_slice %250 {offsets = [0, 0], sizes = [1, 128], strides = [1, 1]} : vector<2x128xf32> to vector<1x128xf32>
    %cst_129 = arith.constant 0.001953125 : f32
    %252 = vector.broadcast %cst_129 : f32 to vector<1x128xf32>
    %253 = arith.mulf %251, %252 : vector<1x128xf32>
    %254 = vector.extract_strided_slice %250 {offsets = [1, 0], sizes = [1, 128], strides = [1, 1]} : vector<2x128xf32> to vector<1x128xf32>
    %cst_130 = arith.constant 0.001953125 : f32
    %255 = vector.broadcast %cst_130 : f32 to vector<1x128xf32>
    %256 = arith.mulf %254, %255 : vector<1x128xf32>
    %257 = arith.mulf %253, %253 : vector<1x128xf32>
    %258 = arith.subf %256, %257 : vector<1x128xf32>
    %cst_131 = arith.constant 9.99999974E-6 : f32
    %259 = vector.broadcast %cst_131 : f32 to vector<1x128xf32>
    %260 = arith.addf %258, %259 : vector<1x128xf32>
    %261 = math.rsqrt %260 : vector<1x128xf32>
    %c0_132 = arith.constant 0 : index
    %c0_133 = arith.constant 0 : index
    %262 = vector.load %arg10[%c0_132, %c0_133] : memref<2x128xf32, #tpu.memory_space<vmem>>, vector<1x128xf32>
    %263 = arith.mulf %261, %262 : vector<1x128xf32>
    %c1_134 = arith.constant 1 : index
    %c0_135 = arith.constant 0 : index
    %264 = vector.load %arg10[%c1_134, %c0_135] : memref<2x128xf32, #tpu.memory_space<vmem>>, vector<1x128xf32>
    %265 = arith.mulf %253, %263 : vector<1x128xf32>
    %266 = arith.subf %264, %265 : vector<1x128xf32>
    %267 = vector.broadcast %263 : vector<1x128xf32> to vector<8x128xf32>
    %268 = arith.mulf %242, %267 : vector<8x128xf32>
    %269 = vector.broadcast %266 : vector<1x128xf32> to vector<8x128xf32>
    %270 = arith.addf %268, %269 : vector<8x128xf32>
    %c0_136 = arith.constant 0 : index
    %c0_137 = arith.constant 0 : index
    %271 = vector.load %arg2[%c0_136, %c0_137] : memref<1x64xf32, #tpu.memory_space<vmem>>, vector<1x64xf32>
    %cst_138 = arith.constant 0.000000e+00 : f32
    %272 = vector.broadcast %cst_138 : f32 to vector<1x64xf32>
    %273 = arith.subf %272, %271 : vector<1x64xf32>
    %274 = math.exp %273 : vector<1x64xf32>
    %cst_139 = arith.constant 1.000000e+00 : f32
    %275 = vector.broadcast %cst_139 : f32 to vector<1x64xf32>
    %276 = arith.addf %275, %274 : vector<1x64xf32>
    %277 = tpu.reciprocal %276 {approx = true} : vector<1x64xf32> -> vector<1x64xf32>
    %278 = arith.mulf %271, %277 : vector<1x64xf32>
    %c0_140 = arith.constant 0 : index
    %c0_141 = arith.constant 0 : index
    %279 = vector.load %arg13[%c0_140, %c0_141] : memref<64x128xf32, #tpu.memory_space<vmem>>, vector<64x128xf32>
    %cst_142 = arith.constant dense<0.000000e+00> : vector<1x128xf32>
    %280 = tpu.matmul %278, %279, %cst_142 {dimension_numbers = #tpu.dot_dimension_numbers<[1], [0], [0], [1], [0, 0, 1, 1], [], []>} : vector<1x64xf32>, vector<64x128xf32>, vector<1x128xf32> -> vector<1x128xf32>
    %c0_143 = arith.constant 0 : index
    %c0_144 = arith.constant 0 : index
    %281 = vector.load %arg14[%c0_143, %c0_144] : memref<1x128xf32, #tpu.memory_space<vmem>>, vector<1x128xf32>
    %282 = arith.addf %280, %281 : vector<1x128xf32>
    %283 = vector.broadcast %282 : vector<1x128xf32> to vector<8x128xf32>
    %284 = arith.addf %270, %283 : vector<8x128xf32>
    %c0_145 = arith.constant 0 : index
    %c0_146 = arith.constant 0 : index
    %285 = vector.load %arg15[%c0_145, %c0_146] : memref<8x128xf32, #tpu.memory_space<vmem>>, vector<8x128xf32>
    tpu.vector_store %arg15[%c0_145, %c0_146], %284 {strides = array<i32>} : memref<8x128xf32, #tpu.memory_space<vmem>>, vector<8x128xf32>,
    return
  }
  func.func @transform_0(%arg0: i32) -> (i32, i32) {
    %c0_i32 = arith.constant 0 : i32
    %c0_i32_0 = arith.constant 0 : i32
    %c0_i32_1 = arith.constant 0 : i32
    return %c0_i32, %c0_i32_0 : i32, i32
  }
  func.func @transform_1(%arg0: i32) -> (i32, i32) {
    %c0_i32 = arith.constant 0 : i32
    %c0_i32_0 = arith.constant 0 : i32
    %c0_i32_1 = arith.constant 0 : i32
    return %c0_i32, %c0_i32_0 : i32, i32
  }
  func.func @transform_2(%arg0: i32) -> (i32, i32) {
    %c0_i32 = arith.constant 0 : i32
    %c0_i32_0 = arith.constant 0 : i32
    %c0_i32_1 = arith.constant 0 : i32
    return %c0_i32, %c0_i32_0 : i32, i32
  }
  func.func @transform_3(%arg0: i32) -> (i32, i32) {
    %c0_i32 = arith.constant 0 : i32
    %c0_i32_0 = arith.constant 0 : i32
    %c0_i32_1 = arith.constant 0 : i32
    return %c0_i32, %c0_i32_0 : i32, i32
  }
  func.func @transform_4(%arg0: i32) -> (i32, i32) {
    %c0_i32 = arith.constant 0 : i32
    %c0_i32_0 = arith.constant 0 : i32
    %c0_i32_1 = arith.constant 0 : i32
    return %c0_i32, %c0_i32_0 : i32, i32
  }
  func.func @transform_5(%arg0: i32) -> (i32, i32) {
    %c0_i32 = arith.constant 0 : i32
    %c0_i32_0 = arith.constant 0 : i32
    %c0_i32_1 = arith.constant 0 : i32
    return %c0_i32, %c0_i32_0 : i32, i32
  }
  func.func @transform_6(%arg0: i32) -> (i32, i32) {
    %c0_i32 = arith.constant 0 : i32
    %c0_i32_0 = arith.constant 0 : i32
    %c0_i32_1 = arith.constant 0 : i32
    return %c0_i32, %c0_i32_0 : i32, i32
  }
  func.func @transform_7(%arg0: i32) -> (i32, i32) {
    %c0_i32 = arith.constant 0 : i32
    %c0_i32_0 = arith.constant 0 : i32
    %c0_i32_1 = arith.constant 0 : i32
    return %c0_i32, %c0_i32_0 : i32, i32
  }
  func.func @transform_8(%arg0: i32) -> (i32, i32) {
    %c0_i32 = arith.constant 0 : i32
    %c0_i32_0 = arith.constant 0 : i32
    %c0_i32_1 = arith.constant 0 : i32
    return %c0_i32, %c0_i32_0 : i32, i32
  }
  func.func @transform_9(%arg0: i32) -> (i32, i32) {
    %c0_i32 = arith.constant 0 : i32
    %c0_i32_0 = arith.constant 0 : i32
    %c0_i32_1 = arith.constant 0 : i32
    return %c0_i32, %c0_i32_0 : i32, i32
  }
  func.func @transform_10(%arg0: i32) -> (i32, i32) {
    %c0_i32 = arith.constant 0 : i32
    %c0_i32_0 = arith.constant 0 : i32
    %c0_i32_1 = arith.constant 0 : i32
    return %c0_i32, %c0_i32_0 : i32, i32
  }
  func.func @transform_11(%arg0: i32) -> (i32, i32) {
    %c0_i32 = arith.constant 0 : i32
    %c0_i32_0 = arith.constant 0 : i32
    %c0_i32_1 = arith.constant 0 : i32
    return %c0_i32, %c0_i32_0 : i32, i32
  }
  func.func @transform_12(%arg0: i32) -> (i32, i32) {
    %c0_i32 = arith.constant 0 : i32
    %c0_i32_0 = arith.constant 0 : i32
    %c0_i32_1 = arith.constant 0 : i32
    return %c0_i32, %c0_i32_0 : i32, i32
  }
  func.func @transform_13(%arg0: i32) -> (i32, i32) {
    %c0_i32 = arith.constant 0 : i32
    %c0_i32_0 = arith.constant 0 : i32
    %c0_i32_1 = arith.constant 0 : i32
    return %c0_i32, %c0_i32_0 : i32, i32
  }
  func.func @transform_14(%arg0: i32) -> (i32, i32) {
    %c0_i32 = arith.constant 0 : i32
    %c0_i32_0 = arith.constant 0 : i32
    %c0_i32_1 = arith.constant 0 : i32
    return %c0_i32, %c0_i32_0 : i32, i32
  }
}

</mosaic_0001>

<bundles_post_ra>
// kernel: tpu_custom_call.1
= control target key start
LH: loop header
LB: loop body
LE: loop exit
PB: predicated region body
PF: predicated region fallthrough
CT: control target
= control target key end

     0   :  { %19 = vsyncpa [#allocation5], 0  ;;  %s2681_s0 = inlined_call_operand.vmem [shape: f32[8,64], index: 0, kind: input, shape index: {}]   ;;  %s2682_s1 = inlined_call_operand.hbm [shape: f32[1,64], index: 1, kind: input, shape index: {}]   ;;  %s2683_s2 = inlined_call_operand.vmem [shape: bf16[192,64], index: 2, kind: input, shape index: {}]   ;;  %s2684_s3 = inlined_call_operand.vmem [shape: bf16[192,64], index: 3, kind: input, shape index: {}]   ;;  %s2685_s4 = inlined_call_operand.hbm [shape: bf16[192,128], index: 4, kind: input, shape index: {}]   ;;  %s2686_s5 = inlined_call_operand.vmem [shape: bf16[384,128], index: 5, kind: input, shape index: {}]   ;;  %s2687_s6 = inlined_call_operand.vmem [shape: f32[2,64], index: 6, kind: input, shape index: {}]   ;;  %s2688_s7 = inlined_call_operand.hbm [shape: f32[2,64], index: 7, kind: input, shape index: {}]   ;;  %s2689_s8 = inlined_call_operand.vmem [shape: f32[2,128], index: 8, kind: input, shape index: {}]   ;;  %s2690_s9 = inlined_call_operand.vmem [shape: f32[2,128], index: 9, kind: input, shape index: {}]   ;;  %s2691_s10 = inlined_call_operand.hbm [shape: f32[64,64], index: 10, kind: input, shape index: {}]   ;;  %s2692_s11 = inlined_call_operand.vmem [shape: f32[128,128], index: 11, kind: input, shape index: {}]   ;;  %s2693_s12 = inlined_call_operand.hbm [shape: f32[64,128], index: 12, kind: input, shape index: {}]   ;;  %s2694_s13 = inlined_call_operand.vmem [shape: f32[1,128], index: 13, kind: input, shape index: {}]   ;;  %s2695_s14 = inlined_call_operand.hbm [shape: f32[8,128], index: 14, kind: output, shape index: {}]  }
   0x1   :  { %20 = vsyncpa [#allocation8], 0 }
   0x2   :  { %21 = vsyncpa [#allocation11], 0 }
   0x3   :  { %22 = vsyncpa [#allocation6], 0  ;;  %s2104_s29 = smov [#allocation7]  }
   0x4   :  { %s44_s30 = sshll.u32 %s2104_s29, 4  ;;  %s45_s30 = int_to_ptr.vmem [resolvable:$true] %s44_s30 }
   0x5   :  { %s1984_s15 = scalar_lea.vmem %s45_s30, 1536  ;;  %p1989_p1 = scmp.lt.s32.totalorder %s45_s30, %s45_s30 }
   0x6   :  { %p1985_p0 = scmp.ne.s32.totalorder %s45_s30, %s1984_s15  ;;  %p1990_p2 = scmp.lt.s32.totalorder %s1984_s15, %s1984_s15 }
   0x8   :  { %p1991_p3 = por %p1990_p2, %p1989_p1 }
   0xa   :  { %p1992_p4 = pnand %p1991_p3, %p1985_p0 }
   0xc   :  { %1995 = shalt.err (!%p1992_p4)
}
   0xd   :  { %s2105_s16 = smov 64   ;;  %s2106_s17 = smov 4  }
   0xe   :  { %50 = dma.hbm_to_vmem [thread:$0]  %s2685_s4, 1536, %s45_s30, [#allocation8], %s2105_s16, %s2105_s16, %s2106_s17  }
   0xf   :  { %s2107_s20 = smov [#allocation10]  }
  0x10   :  { %s74_s21 = sshll.u32 %s2107_s20, 4  ;;  %s75_s21 = int_to_ptr.vmem [resolvable:$true] %s74_s21 }
  0x11   :  { %s2004_s22 = scalar_lea.vmem %s75_s21, 1024  ;;  %p2009_p6 = scmp.lt.s32.totalorder %s75_s21, %s75_s21 }
  0x12   :  { %p2005_p5 = scmp.ne.s32.totalorder %s75_s21, %s2004_s22  ;;  %p2010_p7 = scmp.lt.s32.totalorder %s2004_s22, %s2004_s22 }
  0x14   :  { %p2011_p8 = por %p2010_p7, %p2009_p6 }
  0x16   :  { %p2012_p9 = pnand %p2011_p8, %p2005_p5 }
  0x18   :  { %2015 = shalt.err (!%p2012_p9)
}
  0x19   :  { %s2108_s23 = smov 128   ;;  %s2109_s24 = smov 8  }
  0x1a   :  { %80 = dma.hbm_to_vmem [thread:$0]  %s2691_s10, 1024, %s75_s21, [#allocation11], %s2108_s23, %s2108_s23, %s2109_s24  }
  0x1b   :  { %s2110_s4 = smov [#allocation4]   ;;  %s2111_s28 = smov [#allocation9]  }
  0x1c   :  { %s31_s27 = sshll.u32 %s2110_s4, 4  ;;  %s61_s29 = sshll.u32 %s2111_s28, 4  ;;  %s32_s27 = int_to_ptr.vmem [resolvable:$true] %s31_s27  ;;  %s62_s29 = int_to_ptr.vmem [resolvable:$true] %s61_s29 }
  0x1d   :  { %s2024_s30 = scalar_lea.vmem %s32_s27, 16  ;;  %s2028_s15 = scalar_lea.vmem %s32_s27, 32 }
  0x1e   :  { %p2025_p10 = scmp.ne.s32.totalorder %s32_s27, %s2024_s30  ;;  %p2029_p11 = scmp.lt.s32.totalorder %s32_s27, %s32_s27 }
  0x1f   :  { %p2030_p12 = scmp.lt.s32.totalorder %s2028_s15, %s2024_s30 }
  0x21   :  { %p2031_p13 = por %p2030_p12, %p2029_p11 }
  0x23   :  { %p2032_p0 = pnand %p2031_p13, %p2025_p10 }
  0x25   :  { %2035 = shalt.err (!%p2032_p0)
}
  0x26   :  { %34 = dma.hbm_to_vmem [thread:$0]  %s2682_s1, 16, %s32_s27, [#allocation5]  }
  0x27   :  { %s2044_s19 = scalar_lea.vmem %s62_s29, 32  ;;  %p2049_p2 = scmp.lt.s32.totalorder %s62_s29, %s62_s29 }
  0x28   :  { %p2045_p1 = scmp.ne.s32.totalorder %s62_s29, %s2044_s19  ;;  %p2050_p3 = scmp.lt.s32.totalorder %s2044_s19, %s2044_s19 }
  0x2a   :  { %p2051_p4 = por %p2050_p3, %p2049_p2 }
  0x2c   :  { %p2052_p5 = pnand %p2051_p4, %p2045_p1 }
  0x2e   :  { %2055 = shalt.err (!%p2052_p5)
}
  0x2f   :  { %64 = dma.hbm_to_vmem [thread:$0]  %s2688_s7, 32, %s62_s29, [#allocation8]  }
  0x30   :  { %s2112_s21 = smov [#allocation12]  }
  0x31   :  { %s88_s22 = sshll.u32 %s2112_s21, 4  ;;  %s89_s22 = int_to_ptr.vmem [resolvable:$true] %s88_s22 }
  0x32   :  { %s2064_s25 = scalar_lea.vmem %s89_s22, 1024  ;;  %p2069_p7 = scmp.lt.s32.totalorder %s89_s22, %s89_s22 }
  0x33   :  { %p2065_p6 = scmp.ne.s32.totalorder %s89_s22, %s2064_s25  ;;  %p2070_p8 = scmp.lt.s32.totalorder %s2064_s25, %s2064_s25 }
  0x35   :  { %p2071_p9 = por %p2070_p8, %p2069_p7 }
  0x37   :  { %p2072_p10 = pnand %p2071_p9, %p2065_p6 }
  0x39   :  { %2075 = shalt.err (!%p2072_p10)
}
  0x3a   :  { %94 = dma.hbm_to_vmem [thread:$0]  %s2693_s12, 1024, %s89_s22, [#allocation11], %s2108_s23, %s2108_s23, %s2109_s24  }
  0x3b   :  { %2096 = dma.done.wait [#allocation5], 16  }
  0x3c   :  { %2097 = vsyncadd [#allocation5], 4294967280 }
  0x3d   :  { %2098 = dma.done.wait [#allocation8], 1568  }
  0x3e   :  { %2099 = vsyncadd [#allocation8], 4294965728 }
  0x3f   :  { %2100 = dma.done.wait [#allocation11], 2048  }
  0x40   :  { %2101 = vsyncadd [#allocation11], 4294965248  ;;  %vm114_vm0 = vcmask 523264   ;;  %v2113_v0 = vmov 0.0   ;;  %v2114_v1 = vmov 0   ;;  %vm132_vm1 = vcmask 522240  }
  0x41   :  { %115 = vst.msk [vmem:[#allocation2 + $0x8] sm:$0xff] %vm114_vm0, %v2113_v0  ;;  %113 = vst [vmem:[#allocation2] sm:$0xff] %v2113_v0  ;;  %237 = vmatprep.subr.bf16.mxu0 %v2114_v1  ;;  %1731 = vmatprep.subr.mxu1 %v2113_v0  ;;  %v2225_v2 = vld [vmem:[%s2681_s0] sm:$0xff]  ;;  %vm123_vm2 = vcmask 523265   ;;  %v1891_v5 = vld [vmem:[%s2683_s2 + $0x38] sm:$0xff]   ;;  %vm128_vm3 = vcmask 1048064  }
  0x42   :  { %116 = vst [vmem:[#allocation3 + $0x10] sm:$0xff] %v2113_v0  ;;  %118 = vst [vmem:[#allocation3 + $0x8] sm:$0xff] %v2113_v0  ;;  %125 = vrot.lane.b32.xlu0 %v2225_v2, %s2105_s16  ;;  %v121_v3 = vrot.slane %v2225_v2, 7  ;;  %v130_v4 = vrot.slane %v2225_v2, 1  ;;  %238 = vmatpush1.bf16.msra.mxu0 %v1891_v5  ;;  %v1892_v6 = vld [vmem:[%s2683_s2 + $0x30] sm:$0xff]   ;;  %v1893_v7 = vld [vmem:[%s2683_s2 + $0x28] sm:$0xff]  }
  0x43   :  { %239 = vmatprep.subr.bf16.mxu0 %v2114_v1  ;;  %v1894_v8 = vld [vmem:[%s2683_s2 + $0x20] sm:$0xff]   ;;  %v1895_v10 = vld [vmem:[%s2683_s2 + $0x18] sm:$0xff]   ;;  %v1896_v12 = vld [vmem:[%s2683_s2 + $0x10] sm:$0xff]   ;;  %vm2115_vm4 = vmmov 0   ;;  %vm292_vm5 = vcmask 1040384   ;;  %s2116_s22 = smov [#allocation13]  }
  0x44   :  { %133 = vst.msk [vmem:[#allocation2 + $0x8] sm:$0x7f] %vm132_vm1, %v130_v4  ;;  %v1897_v13 = vld [vmem:[%s2683_s2 + $0x8] sm:$0xff]   ;;  %v1898_v14 = vld [vmem:[%s2683_s2] sm:$0xff]   ;;  %v1899_v15 = vld [vmem:[%s2683_s2 + $0x58] sm:$0xff]   ;;  %1747 = vmatprep.mubr.msk.f32.mxu1 %vm2115_vm4, %v2113_v0  ;;  %s1562_s25 = sshll.u32 %s2116_s22, 4  ;;  %s1563_s25 = int_to_ptr.vmem [resolvable:$true] %s1562_s25 }
  0x45   :  { %124 = vst.msk [vmem:[#allocation2] sm:$0xfe] %vm123_vm2, %v121_v3  ;;  %v1900_v16 = vld [vmem:[%s2683_s2 + $0x50] sm:$0xff]   ;;  %v1901_v17 = vld [vmem:[%s2683_s2 + $0x48] sm:$0xff]   ;;  %v1902_v18 = vld [vmem:[%s2683_s2 + $0x40] sm:$0xff]   ;;  %p2081_p12 = scmp.lt.s32.totalorder %s1563_s25, %s1563_s25 }
  0x46   :  { %240 = vmatpush1.bf16.msra.mxu0 %v1892_v6  ;;  %v301_v22 = vld [vmem:[#allocation10 + $0x38] sm:$0xff]  ;;  %v300_v23 = vld [vmem:[#allocation10 + $0x30] sm:$0xff]  ;;  %v299_v24 = vld [vmem:[#allocation10 + $0x28] sm:$0xff]  ;;  %v394_v6 = vlaneseq }
  0x47   :  { %241 = vmatprep.subr.bf16.mxu0 %v2114_v1  ;;  %1732 = vmatpush3.msra.mxu1 %v301_v22  ;;  %v298_v25 = vld [vmem:[#allocation10 + $0x20] sm:$0xff]  ;;  %v297_v26 = vld [vmem:[#allocation10 + $0x18] sm:$0xff]  ;;  %v296_v27 = vld [vmem:[#allocation10 + $0x10] sm:$0xff] }
  0x48   :  { %1733 = vmatprep.subr.mxu1 %v2113_v0  ;;  %v295_v28 = vld [vmem:[#allocation10 + $0x8] sm:$0xff]  ;;  %v294_v29 = vld [vmem:[#allocation10] sm:$0xff]  ;;  %v1906_v53 = vld [vmem:[%s2684_s3 + $0x20] sm:$0xff]  }
  0x49   :  { %1734 = vmatpush3.msra.mxu1 %v300_v23  ;;  %v1903_v50 = vld [vmem:[%s2684_s3 + $0x38] sm:$0xff]   ;;  %v1904_v51 = vld [vmem:[%s2684_s3 + $0x30] sm:$0xff]   ;;  %v1905_v52 = vld [vmem:[%s2684_s3 + $0x28] sm:$0xff]  }
  0x4a   :  { %242 = vmatpush1.bf16.msra.mxu0 %v1893_v7  ;;  %1735 = vmatprep.subr.mxu1 %v2113_v0  ;;  %v1907_v54 = vld [vmem:[%s2684_s3 + $0x18] sm:$0xff]   ;;  %v1908_v55 = vld [vmem:[%s2684_s3 + $0x10] sm:$0xff]   ;;  %v1909_v56 = vld [vmem:[%s2684_s3 + $0x8] sm:$0xff]  }
  0x4b   :  { %243 = vmatprep.subr.bf16.mxu0 %v2114_v1  ;;  %v135_v9 = vld [vmem:[#allocation2 + $0x8] sm:$0xff]  ;;  %1736 = vmatpush3.msra.mxu1 %v299_v24  ;;  %v1910_v57 = vld [vmem:[%s2684_s3] sm:$0xff]   ;;  %v1911_v61 = vld [vmem:[%s2684_s3 + $0x58] sm:$0xff]  }
  0x4c   :  { %v137_v11 = vpack.c.bf16 %v135_v9, %v135_v9  ;;  %1737 = vmatprep.subr.mxu1 %v2113_v0  ;;  %v1912_v3 = vld [vmem:[%s2684_s3 + $0x50] sm:$0xff]   ;;  %v383_v7 = vld [vmem:[%s2687_s6] sm:$0x1]  ;;  %v395_v9 = vshrl.u32 %v394_v6, 7 }
  0x4d   :  { %1738 = vmatpush3.msra.mxu1 %v298_v25 }
  0x4e   :  { %244 = vmatpush1.bf16.msra.mxu0 %v1894_v8  ;;  %1585 = vmatprep.mubr.msk.bf16.mxu0 %vm114_vm0, %v137_v11  ;;  %v385_v8 = vrot.slane %v383_v7, 7 }
  0x4f   :  { %245 = vmatprep.subr.bf16.mxu0 %v2114_v1  ;;  %1739 = vmatprep.subr.mxu1 %v2113_v0 }
  0x50   :  { %1740 = vmatpush3.msra.mxu1 %v297_v26 }
  0x51   :  { %1741 = vmatprep.subr.mxu1 %v2113_v0 }
  0x52   :  { %246 = vmatpush1.bf16.msra.mxu0 %v1895_v10  ;;  %1742 = vmatpush3.msra.mxu1 %v296_v27 }
  0x53   :  { %247 = vmatprep.subr.bf16.mxu0 %v2114_v1  ;;  %1743 = vmatprep.subr.mxu1 %v2113_v0 }
  0x54   :  { %1744 = vmatpush3.msra.mxu1 %v295_v28 }
  0x55   :  { %1745 = vmatprep.subr.mxu1 %v2113_v0 }
  0x56   :  { %248 = vmatpush1.bf16.msra.mxu0 %v1896_v12  ;;  %1746 = vmatpush3.msra.mxu1 %v294_v29  ;;  %v2355_v12 = vsub.s32 1, %v395_v9 }
  0x57   :  { %249 = vmatprep.subr.bf16.mxu0 %v2114_v1  ;;  %544 = vmatprep.subr.bf16.mxu1 %v2114_v1 }
  0x5a   :  { %250 = vmatpush1.bf16.msra.mxu0 %v1897_v13 }
  0x5b   :  { %251 = vmatprep.subr.bf16.mxu0 %v2114_v1 }
  0x5e   :  { %252 = vmatpush1.bf16.msra.mxu0 %v1898_v14  ;;  %v388_v14 = vld [vmem:[%s2687_s6 + $0x1] sm:$0x1] }
  0x5f   :  { %261 = vmatprep.subr.bf16.mxu0 %v2114_v1 }
  0x62   :  { %262 = vmatpush2.bf16.msra.mxu0 %v1899_v15 }
  0x63   :  { %263 = vmatprep.subr.bf16.mxu0 %v2114_v1 }
  0x66   :  { %264 = vmatpush2.bf16.msra.mxu0 %v1900_v16 }
  0x67   :  { %265 = vmatprep.subr.bf16.mxu0 %v2114_v1 }
  0x6a   :  { %266 = vmatpush2.bf16.msra.mxu0 %v1901_v17  ;;  %v2361_v17 = vsub.s32 0, %v395_v9 }
  0x6b   :  { %267 = vmatprep.subr.bf16.mxu0 %v2114_v1 }
  0x6e   :  { %268 = vmatpush2.bf16.msra.mxu0 %v1902_v18 }
  0x6f   :  { %1750 = vmatprep.subr.mxu0 %v2113_v0 }
  0xb4   :  { %v126_v19 = vpop.permute.xlu0 %125 }
  0xb5   :  { %129 = vst.msk [vmem:[#allocation2] sm:$0xff] %vm128_vm3, %v126_v19 }
  0xbc   :  { %v134_v20 = vld [vmem:[#allocation2] sm:$0xff] }
  0xbd   :  { %v136_v21 = vpack.c.bf16 %v134_v20, %v134_v20 }
  0xbf   :  { %270 = vmatmul.mubr.bf16.vlgmr.msra.gmra.mxu0 %v136_v21 }
  0xc0   :  { %1751 = vmatpush3.msra.mxu0 %v301_v22  ;;  %1766 = vmatprep.mubr.msk.f32.mxu0 %vm2115_vm4, %v2113_v0 }
  0xc1   :  { %1752 = vmatprep.subr.mxu0 %v2113_v0 }
  0xc2   :  { %1753 = vmatpush3.msra.mxu0 %v300_v23 }
  0xc3   :  { %1754 = vmatprep.subr.mxu0 %v2113_v0 }
  0xc4   :  { %1755 = vmatpush3.msra.mxu0 %v299_v24 }
  0xc5   :  { %1756 = vmatprep.subr.mxu0 %v2113_v0 }
  0xc6   :  { %1757 = vmatpush3.msra.mxu0 %v298_v25 }
  0xc7   :  { %1758 = vmatprep.subr.mxu0 %v2113_v0 }
  0xc8   :  { %1759 = vmatpush3.msra.mxu0 %v297_v26 }
  0xc9   :  { %1760 = vmatprep.subr.mxu0 %v2113_v0 }
  0xca   :  { %1761 = vmatpush3.msra.mxu0 %v296_v27 }
  0xcb   :  { %1762 = vmatprep.subr.mxu0 %v2113_v0 }
  0xcc   :  { %1763 = vmatpush3.msra.mxu0 %v295_v28 }
  0xcd   :  { %1764 = vmatprep.subr.mxu0 %v2113_v0 }
  0xce   :  { %1765 = vmatpush3.msra.mxu0 %v294_v29 }
  0xcf   :  { %851 = vmatprep.subr.bf16.mxu0 %v2114_v1 }
 0x17f   :  { %v2303_v30 = vpop.f32.mrf.mxu0 }
 0x180   :  { %v277_v31 = vsel %vm114_vm0, %v2303_v30, 0.0  ;;  %v284_v32 = vmul.f32 %v2303_v30, %v2303_v30 }
 0x181   :  { %v278_v33 = vrot.slane %v277_v31, 4  ;;  %v273_v34 = vpop.f32.mrf.mxu0 }
 0x182   :  { %v285_v35 = vsel %vm114_vm0, %v284_v32, 0.0 }
 0x183   :  { %v279_v36 = vadd.f32 %v278_v33, %v277_v31  ;;  %v286_v37 = vrot.slane %v285_v35, 4  ;;  %v274_v38 = vpop.f32.mrf.mxu0 }
 0x185   :  { %v280_v39 = vrot.slane %v279_v36, 2  ;;  %v287_v40 = vadd.f32 %v286_v37, %v285_v35  ;;  %v275_v41 = vpop.f32.mrf.mxu0 }
 0x187   :  { %v281_v42 = vadd.f32 %v280_v39, %v279_v36  ;;  %v288_v43 = vrot.slane %v287_v40, 2  ;;  %v1913_v39 = vld [vmem:[%s2684_s3 + $0x48] sm:$0xff]  }
 0x189   :  { %v282_v44 = vrot.slane %v281_v42, 1  ;;  %v289_v45 = vadd.f32 %v288_v43, %v287_v40 }
 0x18b   :  { %v290_v46 = vrot.slane %v289_v45, 1  ;;  %v283_v47 = vadd.f32 %v282_v44, %v281_v42  ;;  %v1914_v42 = vld [vmem:[%s2684_s3 + $0x40] sm:$0xff]  }
 0x18d   :  { %v291_v48 = vadd.f32 %v290_v46, %v289_v45 }
 0x18f   :  { %v293_v49 = vsel %vm292_vm5, %v283_v47, %v291_v48 }
 0x190   :  { %1748 = vmatmul.mubr.msk.f32.vlgmr.msra.gmra.mxu1 %vm114_vm0, %v293_v49 }
 0x191   :  { %545 = vmatpush1.bf16.msra.mxu1 %v1903_v50 }
 0x192   :  { %546 = vmatprep.subr.bf16.mxu1 %v2114_v1 }
 0x195   :  { %547 = vmatpush1.bf16.msra.mxu1 %v1904_v51 }
 0x196   :  { %548 = vmatprep.subr.bf16.mxu1 %v2114_v1 }
 0x199   :  { %549 = vmatpush1.bf16.msra.mxu1 %v1905_v52 }
 0x19a   :  { %550 = vmatprep.subr.bf16.mxu1 %v2114_v1 }
 0x19d   :  { %551 = vmatpush1.bf16.msra.mxu1 %v1906_v53 }
 0x19e   :  { %552 = vmatprep.subr.bf16.mxu1 %v2114_v1 }
 0x1a1   :  { %553 = vmatpush1.bf16.msra.mxu1 %v1907_v54 }
 0x1a2   :  { %554 = vmatprep.subr.bf16.mxu1 %v2114_v1 }
 0x1a5   :  { %555 = vmatpush1.bf16.msra.mxu1 %v1908_v55 }
 0x1a6   :  { %556 = vmatprep.subr.bf16.mxu1 %v2114_v1 }
 0x1a9   :  { %557 = vmatpush1.bf16.msra.mxu1 %v1909_v56 }
 0x1aa   :  { %558 = vmatprep.subr.bf16.mxu1 %v2114_v1 }
 0x1ad   :  { %559 = vmatpush1.bf16.msra.mxu1 %v1910_v57 }
 0x1ae   :  { %568 = vmatprep.subr.bf16.mxu1 %v2114_v1 }
 0x1b1   :  { %569 = vmatpush2.bf16.msra.mxu1 %v1911_v61 }
 0x1b2   :  { %570 = vmatprep.subr.bf16.mxu1 %v2114_v1 }
 0x1b5   :  { %571 = vmatpush2.bf16.msra.mxu1 %v1912_v3 }
 0x1b6   :  { %572 = vmatprep.subr.bf16.mxu1 %v2114_v1 }
 0x1b9   :  { %573 = vmatpush2.bf16.msra.mxu1 %v1913_v39  ;;  %v694_v39 = vld [vmem:[#allocation9 + $0x1] sm:$0x1] }
 0x1ba   :  { %574 = vmatprep.subr.bf16.mxu1 %v2114_v1 }
 0x1bd   :  { %575 = vmatpush2.bf16.msra.mxu1 %v1914_v42 }
 0x1be   :  { %1769 = vmatprep.subr.mxu1 %v2113_v0 }
 0x250   :  { %v371_v58 = vpop.f32.mrf.mxu1 }
 0x251   :  { %v375_v59 = vmul.f32 0.00390625, %v371_v58 }
 0x252   :  { %v1749_v60 = vpop.f32.mrf.mxu1 }
 0x253   :  { %v376_v62 = vmul.f32 %v375_v59, %v375_v59 }
 0x255   :  { %v378_v63 = vrot.slane %v376_v62, 7 }
 0x257   :  { %v380_v4 = vsub.f32 %v375_v59, %v378_v63 }
 0x259   :  { %v381_v5 = vadd.f32 1e-05, %v380_v4 }
 0x25b   :  { %1951 = vrsqrt.f32 %v381_v5 }
 0x268   :  { %v1952_v10 = vpop.eup %1951 }
 0x269   :  { %v387_v11 = vmul.f32 %v1952_v10, %v385_v8 }
 0x26b   :  { %v390_v13 = vrot.slane %v387_v11, 1  ;;  %v397_v16 = vrot.slane %v387_v11, %v2355_v12 }
 0x26d   :  { %v392_v15 = vmul.f32 %v390_v13, %v375_v59  ;;  %v398_v20 = vmul.f32 %v397_v16, %v2303_v30  ;;  %v1915_v16 = vld [vmem:[#allocation7 + $0x38] sm:$0xff]  }
 0x26f   :  { %v393_v18 = vsub.f32 %v388_v14, %v392_v15 }
 0x271   :  { %v402_v19 = vrot.slane %v393_v18, %v2361_v17  ;;  %v1916_v18 = vld [vmem:[#allocation7 + $0x30] sm:$0xff]  }
 0x273   :  { %v403_v21 = vadd.f32 %v402_v19, %v398_v20  ;;  %v1917_v19 = vld [vmem:[#allocation7 + $0x28] sm:$0xff]   ;;  %v1918_v20 = vld [vmem:[#allocation7 + $0x20] sm:$0xff]  }
 0x275   :  { %v404_v22 = vmul.f32 0.70710677, %v403_v21  ;;  %v427_v46 = vmul.f32 0.5, %v403_v21  ;;  %v1919_v21 = vld [vmem:[#allocation7 + $0x18] sm:$0xff]  }
 0x277   :  { %v405_v23 = vand.u32 2147483647, %v404_v22  ;;  %vm424_vm6 = vcmp.lt.f32.partialorder %v404_v22, 0.0  ;;  %v1920_v22 = vld [vmem:[#allocation7 + $0x10] sm:$0xff]  }
 0x279   :  { %v406_v24 = vmul.f32 0.3275911, %v405_v23  ;;  %v418_v26 = vsub.f32 0.0, %v405_v23 }
 0x27b   :  { %v407_v25 = vadd.f32 1.0, %v406_v24  ;;  %v419_v27 = vmul.f32 %v418_v26, %v405_v23  ;;  %v1921_v23 = vld [vmem:[#allocation7 + $0x8] sm:$0xff]  }
 0x27d   :  { %1953 = vrcp.f32 %v407_v25  ;;  %v420_v31 = vmul.f32 1.442695, %v419_v27  ;;  %v1922_v25 = vld [vmem:[#allocation7] sm:$0xff]  }
 0x27f   :  { %1955 = vpow2.f32 %v420_v31 }
 0x28a   :  { %v1954_v28 = vpop.eup %1953 }
 0x28b   :  { %v409_v29 = vmul.f32 1.0614054, %v1954_v28 }
 0x28c   :  { %v1956_v40 = vpop.eup %1955 }
 0x28d   :  { %v410_v32 = vadd.f32 -1.4531521, %v409_v29  ;;  %v1923_v29 = vld [vmem:[#allocation7 + $0x58] sm:$0xff]  }
 0x28f   :  { %v411_v33 = vmul.f32 %v1954_v28, %v410_v32 }
 0x291   :  { %v412_v34 = vadd.f32 1.4214138, %v411_v33  ;;  %v1924_v33 = vld [vmem:[#allocation7 + $0x50] sm:$0xff]  }
 0x293   :  { %v413_v35 = vmul.f32 %v1954_v28, %v412_v34 }
 0x295   :  { %v414_v36 = vadd.f32 -0.28449672, %v413_v35  ;;  %v689_v35 = vld [vmem:[#allocation9] sm:$0x1] }
 0x297   :  { %v415_v37 = vmul.f32 %v1954_v28, %v414_v36  ;;  %v691_v36 = vrot.slane %v689_v35, 7  ;;  %v2511_v35 = vld [vmem:[%s2692_s11 + $0x8] sm:$0xff] }
 0x299   :  { %v416_v38 = vadd.f32 0.2548296, %v415_v37 }
 0x29b   :  { %v417_v30 = vmul.f32 %v1954_v28, %v416_v38 }
 0x29d   :  { %v422_v41 = vmul.f32 %v1956_v40, %v417_v30 }
 0x29f   :  { %v423_v43 = vsub.f32 1.0, %v422_v41 }
 0x2a1   :  { %v425_v44 = vsub.f32 0.0, %v423_v43 }
 0x2a3   :  { %v426_v45 = vsel %vm424_vm6, %v425_v44, %v423_v43 }
 0x2a4   :  { %v428_v47 = vadd.f32 1.0, %v426_v45 }
 0x2a6   :  { %v429_v48 = vmul.f32 %v428_v47, %v427_v46 }
 0x2a8   :  { %434 = vrot.lane.b32.xlu0 %v429_v48, %s2105_s16  ;;  %v431_v49 = vrot.slane %v429_v48, 7  ;;  %v438_v50 = vrot.slane %v429_v48, 1 }
 0x2aa   :  { %440 = vst.msk [vmem:[#allocation2 + $0x8] sm:$0x7f] %vm132_vm1, %v438_v50 }
 0x2ab   :  { %433 = vst.msk [vmem:[#allocation2] sm:$0xfe] %vm123_vm2, %v431_v49 }
 0x2b1   :  { %v442_v51 = vld [vmem:[#allocation2 + $0x8] sm:$0xff] }
 0x2b2   :  { %v444_v52 = vpack.c.bf16 %v442_v51, %v442_v51 }
 0x2b4   :  { %1599 = vmatprep.mubr.msk.bf16.mxu1 %vm114_vm0, %v444_v52 }
 0x31a   :  { %v435_v53 = vpop.permute.xlu0 %434 }
 0x31b   :  { %437 = vst.msk [vmem:[#allocation2] sm:$0xff] %vm128_vm3, %v435_v53 }
 0x322   :  { %v441_v54 = vld [vmem:[#allocation2] sm:$0xff] }
 0x323   :  { %v443_v55 = vpack.c.bf16 %v441_v54, %v441_v54 }
 0x325   :  { %577 = vmatmul.mubr.bf16.vlgmr.msra.gmra.mxu1 %v443_v55 }
 0x326   :  { %1801 = vmatprep.mubr.msk.f32.mxu1 %vm2115_vm4, %v2113_v0 }
 0x3e5   :  { %v2380_v56 = vpop.f32.mrf.mxu1 }
 0x3e6   :  { %v584_v57 = vsel %vm114_vm0, %v2380_v56, 0.0  ;;  %v591_v58 = vmul.f32 %v2380_v56, %v2380_v56 }
 0x3e7   :  { %v585_v59 = vrot.slane %v584_v57, 4  ;;  %v580_v60 = vpop.f32.mrf.mxu1 }
 0x3e8   :  { %v592_v61 = vsel %vm114_vm0, %v591_v58, 0.0 }
 0x3e9   :  { %v586_v62 = vadd.f32 %v585_v59, %v584_v57  ;;  %v593_v63 = vrot.slane %v592_v61, 4  ;;  %v581_v3 = vpop.f32.mrf.mxu1 }
 0x3eb   :  { %v587_v4 = vrot.slane %v586_v62, 2  ;;  %v594_v5 = vadd.f32 %v593_v63, %v592_v61  ;;  %v582_v6 = vpop.f32.mrf.mxu1 }
 0x3ed   :  { %v588_v7 = vadd.f32 %v587_v4, %v586_v62  ;;  %v595_v8 = vrot.slane %v594_v5, 2 }
 0x3ef   :  { %v589_v9 = vrot.slane %v588_v7, 1  ;;  %v596_v10 = vadd.f32 %v595_v8, %v594_v5  ;;  %v1926_v5 = vld [vmem:[#allocation7 + $0x40] sm:$0xff]  }
 0x3f1   :  { %v597_v11 = vrot.slane %v596_v10, 1  ;;  %v590_v13 = vadd.f32 %v589_v9, %v588_v7 }
 0x3f3   :  { %v598_v14 = vadd.f32 %v597_v11, %v596_v10  ;;  %v2408_v11 = vld [vmem:[%s2692_s11 + $0x78] sm:$0xff] }
 0x3f4   :  { %1770 = vmatpush3.msra.mxu1 %v2408_v11 }
 0x3f5   :  { %v599_v15 = vsel %vm292_vm5, %v590_v13, %v598_v14  ;;  %v2413_v13 = vld [vmem:[%s2692_s11 + $0x70] sm:$0xff]  ;;  %1771 = vmatprep.subr.mxu1 %v2113_v0  ;;  %v2420_v14 = vld [vmem:[%s2692_s11 + $0x68] sm:$0xff] }
 0x3f6   :  { %1767 = vmatmul.mubr.msk.f32.vlgmr.msra.gmra.mxu0 %vm114_vm0, %v599_v15  ;;  %1772 = vmatpush3.msra.mxu1 %v2413_v13 }
 0x3f7   :  { %852 = vmatpush1.bf16.msra.mxu0 %v1915_v16  ;;  %1773 = vmatprep.subr.mxu1 %v2113_v0 }
 0x3f8   :  { %853 = vmatprep.subr.bf16.mxu0 %v2114_v1  ;;  %1774 = vmatpush3.msra.mxu1 %v2420_v14 }
 0x3f9   :  { %1775 = vmatprep.subr.mxu1 %v2113_v0 }
 0x3fb   :  { %854 = vmatpush1.bf16.msra.mxu0 %v1916_v18  ;;  %v2428_v18 = vld [vmem:[%s2692_s11 + $0x60] sm:$0xff] }
 0x3fc   :  { %855 = vmatprep.subr.bf16.mxu0 %v2114_v1  ;;  %1776 = vmatpush3.msra.mxu1 %v2428_v18 }
 0x3fd   :  { %1777 = vmatprep.subr.mxu1 %v2113_v0 }
 0x3ff   :  { %856 = vmatpush1.bf16.msra.mxu0 %v1917_v19  ;;  %v2437_v19 = vld [vmem:[%s2692_s11 + $0x58] sm:$0xff] }
 0x400   :  { %857 = vmatprep.subr.bf16.mxu0 %v2114_v1  ;;  %1778 = vmatpush3.msra.mxu1 %v2437_v19 }
 0x401   :  { %1779 = vmatprep.subr.mxu1 %v2113_v0 }
 0x403   :  { %858 = vmatpush1.bf16.msra.mxu0 %v1918_v20  ;;  %v2444_v20 = vld [vmem:[%s2692_s11 + $0x50] sm:$0xff] }
 0x404   :  { %859 = vmatprep.subr.bf16.mxu0 %v2114_v1  ;;  %1780 = vmatpush3.msra.mxu1 %v2444_v20 }
 0x405   :  { %1781 = vmatprep.subr.mxu1 %v2113_v0 }
 0x407   :  { %860 = vmatpush1.bf16.msra.mxu0 %v1919_v21  ;;  %v2451_v21 = vld [vmem:[%s2692_s11 + $0x48] sm:$0xff] }
 0x408   :  { %861 = vmatprep.subr.bf16.mxu0 %v2114_v1  ;;  %1782 = vmatpush3.msra.mxu1 %v2451_v21 }
 0x409   :  { %1783 = vmatprep.subr.mxu1 %v2113_v0 }
 0x40b   :  { %862 = vmatpush1.bf16.msra.mxu0 %v1920_v22 }
 0x40c   :  { %863 = vmatprep.subr.bf16.mxu0 %v2114_v1 }
 0x40f   :  { %864 = vmatpush1.bf16.msra.mxu0 %v1921_v23  ;;  %v2458_v23 = vld [vmem:[%s2692_s11 + $0x40] sm:$0xff] }
 0x410   :  { %865 = vmatprep.subr.bf16.mxu0 %v2114_v1  ;;  %1784 = vmatpush3.msra.mxu1 %v2458_v23 }
 0x411   :  { %1785 = vmatprep.subr.mxu1 %v2113_v0 }
 0x413   :  { %866 = vmatpush1.bf16.msra.mxu0 %v1922_v25 }
 0x414   :  { %875 = vmatprep.subr.bf16.mxu0 %v2114_v1 }
 0x417   :  { %876 = vmatpush2.bf16.msra.mxu0 %v1923_v29  ;;  %v2478_v29 = vld [vmem:[%s2692_s11 + $0x30] sm:$0xff] }
 0x418   :  { %877 = vmatprep.subr.bf16.mxu0 %v2114_v1 }
 0x41b   :  { %878 = vmatpush2.bf16.msra.mxu0 %v1924_v33  ;;  %v2499_v33 = vld [vmem:[%s2692_s11 + $0x18] sm:$0xff] }
 0x41c   :  { %879 = vmatprep.subr.bf16.mxu0 %v2114_v1 }
 0x4b6   :  { %v677_v24 = vpop.f32.mrf.mxu0 }
 0x4b7   :  { %v681_v26 = vmul.f32 0.00390625, %v677_v24 }
 0x4b8   :  { %v1768_v27 = vpop.f32.mrf.mxu0 }
 0x4b9   :  { %v682_v28 = vmul.f32 %v681_v26, %v681_v26 }
 0x4bb   :  { %v684_v31 = vrot.slane %v682_v28, 7  ;;  %v2471_v28 = vld [vmem:[%s2692_s11 + $0x38] sm:$0xff] }
 0x4bc   :  { %1786 = vmatpush3.msra.mxu1 %v2471_v28 }
 0x4bd   :  { %v686_v32 = vsub.f32 %v681_v26, %v684_v31  ;;  %1787 = vmatprep.subr.mxu1 %v2113_v0  ;;  %v2485_v31 = vld [vmem:[%s2692_s11 + $0x28] sm:$0xff] }
 0x4be   :  { %1788 = vmatpush3.msra.mxu1 %v2478_v29 }
 0x4bf   :  { %v687_v34 = vadd.f32 1e-05, %v686_v32  ;;  %1789 = vmatprep.subr.mxu1 %v2113_v0  ;;  %v2492_v32 = vld [vmem:[%s2692_s11 + $0x20] sm:$0xff] }
 0x4c0   :  { %1790 = vmatpush3.msra.mxu1 %v2485_v31 }
 0x4c1   :  { %1957 = vrsqrt.f32 %v687_v34  ;;  %1791 = vmatprep.subr.mxu1 %v2113_v0  ;;  %v2505_v34 = vld [vmem:[%s2692_s11 + $0x10] sm:$0xff] }
 0x4c2   :  { %1792 = vmatpush3.msra.mxu1 %v2492_v32 }
 0x4c3   :  { %1793 = vmatprep.subr.mxu1 %v2113_v0 }
 0x4c4   :  { %1794 = vmatpush3.msra.mxu1 %v2499_v33 }
 0x4c5   :  { %1795 = vmatprep.subr.mxu1 %v2113_v0 }
 0x4c6   :  { %1796 = vmatpush3.msra.mxu1 %v2505_v34 }
 0x4c7   :  { %1797 = vmatprep.subr.mxu1 %v2113_v0 }
 0x4c8   :  { %1798 = vmatpush3.msra.mxu1 %v2511_v35 }
 0x4c9   :  { %1799 = vmatprep.subr.mxu1 %v2113_v0 }
 0x4ce   :  { %v1958_v37 = vpop.eup %1957 }
 0x4cf   :  { %v693_v38 = vmul.f32 %v1958_v37, %v691_v36  ;;  %v2518_v36 = vld [vmem:[%s2692_s11] sm:$0xff] }
 0x4d0   :  { %1800 = vmatpush3.msra.mxu1 %v2518_v36 }
 0x4d1   :  { %v696_v30 = vrot.slane %v693_v38, 1  ;;  %v703_v41 = vrot.slane %v693_v38, %v2355_v12 }
 0x4d3   :  { %v698_v40 = vmul.f32 %v696_v30, %v681_v26  ;;  %v704_v44 = vmul.f32 %v703_v41, %v2380_v56 }
 0x4d5   :  { %v699_v42 = vsub.f32 %v694_v39, %v698_v40 }
 0x4d7   :  { %v708_v43 = vrot.slane %v699_v42, %v2361_v17 }
 0x4d9   :  { %v709_v45 = vadd.f32 %v708_v43, %v704_v44 }
 0x4db   :  { %v710_v46 = vadd.f32 %v709_v45, %v2225_v2  ;;  %v1925_v2 = vld [vmem:[#allocation7 + $0x48] sm:$0xff]  }
 0x4dc   :  { %880 = vmatpush2.bf16.msra.mxu0 %v1925_v2  ;;  %v1937_v2 = vld [vmem:[%s2686_s5 + $0x20] sm:$0xff]  }
 0x4dd   :  { %v711_v47 = vmul.f32 0.70710677, %v710_v46  ;;  %881 = vmatprep.subr.bf16.mxu0 %v2114_v1  ;;  %v734_v9 = vmul.f32 0.5, %v710_v46 }
 0x4df   :  { %v712_v48 = vand.u32 2147483647, %v711_v47  ;;  %vm731_vm7 = vcmp.lt.f32.partialorder %v711_v47, 0.0 }
 0x4e0   :  { %882 = vmatpush2.bf16.msra.mxu0 %v1926_v5  ;;  %v1940_v5 = vld [vmem:[%s2686_s5 + $0x18] sm:$0xff]  }
 0x4e1   :  { %v713_v49 = vmul.f32 0.3275911, %v712_v48  ;;  %v725_v51 = vsub.f32 0.0, %v712_v48  ;;  %1804 = vmatprep.subr.bf16.mxu0 %v2113_v0 }
 0x4e3   :  { %v714_v50 = vadd.f32 1.0, %v713_v49  ;;  %v726_v52 = vmul.f32 %v725_v51, %v712_v48 }
 0x4e5   :  { %1959 = vrcp.f32 %v714_v50  ;;  %v727_v55 = vmul.f32 1.442695, %v726_v52 }
 0x4e7   :  { %1961 = vpow2.f32 %v727_v55  ;;  %v1929_v55 = vld [vmem:[%s2686_s5 + $0xb8] sm:$0xff]  }
 0x4f2   :  { %v1960_v53 = vpop.eup %1959 }
 0x4f3   :  { %v716_v54 = vmul.f32 1.0614054, %v1960_v53 }
 0x4f4   :  { %v1962_v3 = vpop.eup %1961 }
 0x4f5   :  { %v717_v57 = vadd.f32 -1.4531521, %v716_v54  ;;  %v1928_v54 = vld [vmem:[%s2686_s5 + $0x38] sm:$0xff]  }
 0x4f7   :  { %v718_v58 = vmul.f32 %v1960_v53, %v717_v57  ;;  %v1930_v57 = vld [vmem:[%s2686_s5 + $0x70] sm:$0xff]  }
 0x4f9   :  { %v719_v59 = vadd.f32 1.4214138, %v718_v58  ;;  %v2542_v58 = vld [vmem:[#allocation3 + $0x10] sm:$0xff] }
 0x4fb   :  { %v720_v60 = vmul.f32 %v1960_v53, %v719_v59  ;;  %v1931_v59 = vld [vmem:[%s2686_s5 + $0x30] sm:$0xff]  }
 0x4fd   :  { %v721_v61 = vadd.f32 -0.28449672, %v720_v60  ;;  %v1932_v60 = vld [vmem:[%s2686_s5 + $0xb0] sm:$0xff]  }
 0x4ff   :  { %v722_v56 = vmul.f32 %v1960_v53, %v721_v61  ;;  %v1933_v61 = vld [vmem:[%s2686_s5 + $0x68] sm:$0xff]  }
 0x501   :  { %v723_v62 = vadd.f32 0.2548296, %v722_v56  ;;  %v1934_v56 = vld [vmem:[%s2686_s5 + $0x28] sm:$0xff]  }
 0x503   :  { %v724_v63 = vmul.f32 %v1960_v53, %v723_v62  ;;  %v1927_v53 = vld [vmem:[%s2686_s5 + $0x78] sm:$0xff]   ;;  %v1935_v62 = vld [vmem:[%s2686_s5 + $0xa8] sm:$0xff]  }
 0x504   :  { %1674 = vmatprep.subr.bf16.mxu1 %v1927_v53 }
 0x505   :  { %v729_v4 = vmul.f32 %v1962_v3, %v724_v63  ;;  %v1936_v63 = vld [vmem:[%s2686_s5 + $0x60] sm:$0xff]  }
 0x506   :  { %v1938_v3 = vld [vmem:[%s2686_s5 + $0xa0] sm:$0xff]  }
 0x507   :  { %v730_v6 = vsub.f32 1.0, %v729_v4  ;;  %v1939_v4 = vld [vmem:[%s2686_s5 + $0x58] sm:$0xff]  }
 0x509   :  { %v732_v7 = vsub.f32 0.0, %v730_v6 }
 0x50b   :  { %v733_v8 = vsel %vm731_vm7, %v732_v7, %v730_v6  ;;  %v1941_v6 = vld [vmem:[%s2686_s5 + $0x98] sm:$0xff]   ;;  %v1942_v7 = vld [vmem:[%s2686_s5 + $0x50] sm:$0xff]  }
 0x50c   :  { %v735_v10 = vadd.f32 1.0, %v733_v8  ;;  %v1943_v8 = vld [vmem:[%s2686_s5 + $0x10] sm:$0xff]  }
 0x50e   :  { %v736_v1 = vmul.f32 %v735_v10, %v734_v9  ;;  %v1944_v9 = vld [vmem:[%s2686_s5 + $0x90] sm:$0xff]   ;;  %v1945_v10 = vld [vmem:[%s2686_s5 + $0x48] sm:$0xff]  }
 0x510   :  { %741 = vrot.lane.b32.xlu1 %v736_v1, %s2105_s16  ;;  %v738_v15 = vrot.slane %v736_v1, 7  ;;  %v745_v16 = vrot.slane %v736_v1, 1  ;;  %v1946_v1 = vld [vmem:[%s2686_s5 + $0x8] sm:$0xff]  }
 0x512   :  { %747 = vst.msk [vmem:[#allocation2 + $0x8] sm:$0x7f] %vm132_vm1, %v745_v16  ;;  %v1948_v16 = vld [vmem:[%s2686_s5 + $0x40] sm:$0xff]  }
 0x513   :  { %740 = vst.msk [vmem:[#allocation2] sm:$0xfe] %vm123_vm2, %v738_v15  ;;  %v1947_v15 = vld [vmem:[%s2686_s5 + $0x88] sm:$0xff]  }
 0x519   :  { %v749_v22 = vld [vmem:[#allocation2 + $0x8] sm:$0xff] }
 0x51a   :  { %v751_v24 = vpack.c.bf16 %v749_v22, %v749_v22  ;;  %v1949_v22 = vld [vmem:[%s2686_s5] sm:$0xff]  }
 0x51c   :  { %1613 = vmatprep.mubr.msk.bf16.mxu0 %vm114_vm0, %v751_v24  ;;  %v1950_v24 = vld [vmem:[%s2686_s5 + $0x80] sm:$0xff]  }
 0x582   :  { %v742_v25 = vpop.permute.xlu1 %741 }
 0x583   :  { %744 = vst.msk [vmem:[#allocation2] sm:$0xff] %vm128_vm3, %v742_v25 }
 0x58a   :  { %v748_v26 = vld [vmem:[#allocation2] sm:$0xff] }
 0x58b   :  { %v750_v27 = vpack.c.bf16 %v748_v26, %v748_v26 }
 0x58d   :  { %884 = vmatmul.mubr.bf16.vlgmr.msra.gmra.mxu0 %v750_v27 }
 0x58e   :  { %1820 = vmatprep.mubr.msk.bf16.mxu0 %vm2115_vm4, %v2113_v0  ;;  %1805 = vmatpush3.bf16.msra.mxu0 %v1929_v55 }
 0x58f   :  { %1806 = vmatprep.subr.bf16.mxu0 %v2542_v58 }
 0x592   :  { %1807 = vmatpush3.bf16.msra.mxu0 %v1932_v60 }
 0x593   :  { %1808 = vmatprep.subr.bf16.mxu0 %v2542_v58 }
 0x596   :  { %1809 = vmatpush3.bf16.msra.mxu0 %v1935_v62 }
 0x597   :  { %1810 = vmatprep.subr.bf16.mxu0 %v2542_v58 }
 0x59a   :  { %1811 = vmatpush3.bf16.msra.mxu0 %v1938_v3 }
 0x59b   :  { %1812 = vmatprep.subr.bf16.mxu0 %v2542_v58 }
 0x59e   :  { %1813 = vmatpush3.bf16.msra.mxu0 %v1941_v6 }
 0x59f   :  { %1814 = vmatprep.subr.bf16.mxu0 %v2542_v58 }
 0x5a2   :  { %1815 = vmatpush3.bf16.msra.mxu0 %v1944_v9 }
 0x5a3   :  { %1816 = vmatprep.subr.bf16.mxu0 %v2542_v58 }
 0x5a6   :  { %1817 = vmatpush3.bf16.msra.mxu0 %v1947_v15 }
 0x5a7   :  { %1818 = vmatprep.subr.bf16.mxu0 %v2542_v58 }
 0x5aa   :  { %1819 = vmatpush3.bf16.msra.mxu0 %v1950_v24 }
 0x5ab   :  { %1859 = vmatprep.subr.mxu0 %v2542_v58 }
 0x64d   :  { %v2523_v37 = vpop.f32.mrf.mxu0 }
 0x64e   :  { %v891_v38 = vrot.slane %v2523_v37, 4  ;;  %v897_v30 = vmul.f32 %v2523_v37, %v2523_v37 }
 0x64f   :  { %v887_v39 = vpop.f32.mrf.mxu0 }
 0x650   :  { %v892_v40 = vadd.f32 %v891_v38, %v2523_v37  ;;  %v898_v41 = vrot.slane %v897_v30, 4 }
 0x651   :  { %v888_v42 = vpop.f32.mrf.mxu0 }
 0x652   :  { %v893_v43 = vrot.slane %v892_v40, 2  ;;  %v899_v44 = vadd.f32 %v898_v41, %v897_v30  ;;  %v999_v41 = vld [vmem:[%s2689_s8] sm:$0x1] }
 0x653   :  { %v889_v45 = vpop.f32.mrf.mxu0  ;;  %v1001_v42 = vrot.slane %v999_v41, 7 }
 0x654   :  { %v894_v46 = vadd.f32 %v893_v43, %v892_v40  ;;  %v900_v47 = vrot.slane %v899_v44, 2 }
 0x656   :  { %v895_v0 = vrot.slane %v894_v46, 1  ;;  %v901_v48 = vadd.f32 %v900_v47, %v899_v44 }
 0x658   :  { %v902_v49 = vrot.slane %v901_v48, 1  ;;  %v896_v50 = vadd.f32 %v895_v0, %v894_v46  ;;  %v1004_v46 = vld [vmem:[%s2689_s8 + $0x1] sm:$0x1] }
 0x65a   :  { %v903_v51 = vadd.f32 %v902_v49, %v901_v48 }
 0x65c   :  { %v904_v52 = vsel %vm292_vm5, %v896_v50, %v903_v51 }
 0x65d   :  { %1802 = vmatmul.mubr.f32.vlgmr.msra.gmra.mxu1 %v904_v52 }
 0x65e   :  { %1675 = vmatpush3.bf16.msra.mxu1 %v1928_v54 }
 0x65f   :  { %1676 = vmatprep.subr.bf16.mxu1 %v1930_v57 }
 0x662   :  { %1677 = vmatpush3.bf16.msra.mxu1 %v1931_v59 }
 0x663   :  { %1678 = vmatprep.subr.bf16.mxu1 %v1933_v61 }
 0x666   :  { %1679 = vmatpush3.bf16.msra.mxu1 %v1934_v56 }
 0x667   :  { %1680 = vmatprep.subr.bf16.mxu1 %v1936_v63 }
 0x66a   :  { %1681 = vmatpush3.bf16.msra.mxu1 %v1937_v2 }
 0x66b   :  { %1682 = vmatprep.subr.bf16.mxu1 %v1939_v4 }
 0x66e   :  { %1683 = vmatpush3.bf16.msra.mxu1 %v1940_v5 }
 0x66f   :  { %1684 = vmatprep.subr.bf16.mxu1 %v1942_v7 }
 0x672   :  { %1685 = vmatpush3.bf16.msra.mxu1 %v1943_v8 }
 0x673   :  { %1686 = vmatprep.subr.bf16.mxu1 %v1945_v10 }
 0x676   :  { %1687 = vmatpush3.bf16.msra.mxu1 %v1946_v1 }
 0x677   :  { %1688 = vmatprep.subr.bf16.mxu1 %v1948_v16 }
 0x67a   :  { %1689 = vmatpush3.bf16.msra.mxu1 %v1949_v22 }
 0x67b   :  { %1824 = vmatprep.subr.mxu1 %v2542_v58 }
 0x71d   :  { %v987_v25 = vpop.f32.mrf.mxu1 }
 0x71e   :  { %v991_v26 = vmul.f32 0.001953125, %v987_v25 }
 0x71f   :  { %v1803_v27 = vpop.f32.mrf.mxu1 }
 0x720   :  { %v992_v38 = vmul.f32 %v991_v26, %v991_v26 }
 0x722   :  { %v994_v30 = vrot.slane %v992_v38, 7 }
 0x724   :  { %v996_v39 = vsub.f32 %v991_v26, %v994_v30 }
 0x726   :  { %v997_v40 = vadd.f32 1e-05, %v996_v39 }
 0x728   :  { %1963 = vrsqrt.f32 %v997_v40 }
 0x735   :  { %v1964_v43 = vpop.eup %1963 }
 0x736   :  { %v1003_v44 = vmul.f32 %v1964_v43, %v1001_v42 }
 0x738   :  { %v1006_v45 = vrot.slane %v1003_v44, 1  ;;  %v1013_v0 = vrot.slane %v1003_v44, %v2355_v12 }
 0x73a   :  { %v1008_v47 = vmul.f32 %v1006_v45, %v991_v26  ;;  %v1014_v49 = vmul.f32 %v1013_v0, %v2523_v37 }
 0x73c   :  { %v1009_v48 = vsub.f32 %v1004_v46, %v1008_v47 }
 0x73e   :  { %v1018_v50 = vrot.slane %v1009_v48, %v2361_v17 }
 0x740   :  { %v1019_v51 = vadd.f32 %v1018_v50, %v1014_v49 }
 0x742   :  { %v1020_v52 = vmul.f32 0.70710677, %v1019_v51  ;;  %v1043_v15 = vmul.f32 0.5, %v1019_v51 }
 0x744   :  { %v1021_v53 = vand.u32 2147483647, %v1020_v52  ;;  %vm1040_vm8 = vcmp.lt.f32.partialorder %v1020_v52, 0.0 }
 0x746   :  { %v1022_v54 = vmul.f32 0.3275911, %v1021_v53  ;;  %v1034_v57 = vsub.f32 0.0, %v1021_v53 }
 0x748   :  { %v1023_v55 = vadd.f32 1.0, %v1022_v54  ;;  %v1035_v59 = vmul.f32 %v1034_v57, %v1021_v53 }
 0x74a   :  { %1965 = vrcp.f32 %v1023_v55  ;;  %v1036_v56 = vmul.f32 1.442695, %v1035_v59 }
 0x74c   :  { %1967 = vpow2.f32 %v1036_v56 }
 0x757   :  { %v1966_v60 = vpop.eup %1965 }
 0x758   :  { %v1025_v61 = vmul.f32 1.0614054, %v1966_v60 }
 0x759   :  { %v1968_v7 = vpop.eup %1967 }
 0x75a   :  { %v1026_v62 = vadd.f32 -1.4531521, %v1025_v61 }
 0x75c   :  { %v1027_v63 = vmul.f32 %v1966_v60, %v1026_v62 }
 0x75e   :  { %v1028_v2 = vadd.f32 1.4214138, %v1027_v63 }
 0x760   :  { %v1029_v3 = vmul.f32 %v1966_v60, %v1028_v2 }
 0x762   :  { %v1030_v4 = vadd.f32 -0.28449672, %v1029_v3 }
 0x764   :  { %v1031_v37 = vmul.f32 %v1966_v60, %v1030_v4 }
 0x766   :  { %v1032_v5 = vadd.f32 0.2548296, %v1031_v37 }
 0x768   :  { %v1033_v6 = vmul.f32 %v1966_v60, %v1032_v5 }
 0x76a   :  { %v1038_v8 = vmul.f32 %v1968_v7, %v1033_v6 }
 0x76c   :  { %v1039_v9 = vsub.f32 1.0, %v1038_v8  ;;  %v1440_v8 = vld [vmem:[%s2690_s9] sm:$0x1] }
 0x76e   :  { %v1041_v10 = vsub.f32 0.0, %v1039_v9 }
 0x770   :  { %v1042_v1 = vsel %vm1040_vm8, %v1041_v10, %v1039_v9  ;;  %v1442_v9 = vrot.slane %v1440_v8, 7 }
 0x771   :  { %v1044_v16 = vadd.f32 1.0, %v1042_v1 }
 0x773   :  { %v1045_v22 = vmul.f32 %v1044_v16, %v1043_v15  ;;  %v1476_v15 = vld [vmem:[%s2694_s13] sm:$0x1]  ;;  %s2076_s13 = scalar_lea.vmem %s1563_s25, 128 }
 0x774   :  { %p2077_p11 = scmp.ne.s32.totalorder %s1563_s25, %s2076_s13  ;;  %p2082_p13 = scmp.lt.s32.totalorder %s2076_s13, %s2076_s13 }
 0x775   :  { %v1047_v24 = vrot.slane %v1045_v22, 7  ;;  %v1051_v25 = vrot.slane %v1045_v22, 1  ;;  %v1058_v26 = vpack.c.bf16 %v1045_v22, %v1045_v22  ;;  %v1445_v22 = vld [vmem:[%s2690_s9 + $0x1] sm:$0x1] }
 0x776   :  { %p2083_p0 = por %p2082_p13, %p2081_p12 }
 0x777   :  { %1049 = vst [vmem:[#allocation3 + $0x10] sm:$0xfe] %v1047_v24  ;;  %1053 = vst [vmem:[#allocation3 + $0x8] sm:$0x7f] %v1051_v25  ;;  %1284 = vmatprep.mubr.bf16.mxu1 %v1058_v26 }
 0x778   :  { %p2084_p1 = pnand %p2083_p0, %p2077_p11 }
 0x77e   :  { %v1054_v27 = vld [vmem:[#allocation3 + $0x10] sm:$0xff]  ;;  %v1056_v38 = vld [vmem:[#allocation3 + $0x8] sm:$0xff] }
 0x77f   :  { %v1057_v30 = vpack.c.bf16 %v1054_v27, %v1054_v27  ;;  %v1059_v39 = vpack.c.bf16 %v1056_v38, %v1056_v38 }
 0x781   :  { %1285 = vmatmul.mubr.bf16.vlgmr.msra.gmra.mxu1 %v1057_v30  ;;  %1821 = vmatmul.mubr.bf16.vlgmr.msra.gmra.mxu0 %v1059_v39 }
 0x782   :  { %1825 = vmatpush3.msra.mxu1 %v2408_v11  ;;  %1856 = vmatprep.mubr.msk.f32.mxu1 %vm2115_vm4, %v2542_v58  ;;  %v1461_v11 = vld [vmem:[#allocation4] sm:$0x1] }
 0x783   :  { %1826 = vmatprep.subr.mxu1 %v2542_v58  ;;  %1875 = vmatprep.mubr.msk.f32.mxu0 %vm2115_vm4, %v2542_v58 }
 0x784   :  { %1827 = vmatpush3.msra.mxu1 %v2413_v13  ;;  %v1462_v13 = vsub.f32 0.0, %v1461_v11 }
 0x785   :  { %1828 = vmatprep.subr.mxu1 %v2542_v58 }
 0x786   :  { %1829 = vmatpush3.msra.mxu1 %v2420_v14  ;;  %v1463_v14 = vmul.f32 1.442695, %v1462_v13 }
 0x787   :  { %1830 = vmatprep.subr.mxu1 %v2542_v58 }
 0x788   :  { %1831 = vmatpush3.msra.mxu1 %v2428_v18  ;;  %1969 = vpow2.f32 %v1463_v14  ;;  %v1475_v18 = vld [vmem:[#allocation12 + $0x38] sm:$0xff] }
 0x789   :  { %1832 = vmatprep.subr.mxu1 %v2542_v58  ;;  %1860 = vmatpush3.msra.mxu0 %v1475_v18 }
 0x78a   :  { %1833 = vmatpush3.msra.mxu1 %v2437_v19  ;;  %v1474_v19 = vld [vmem:[#allocation12 + $0x30] sm:$0xff]  ;;  %1861 = vmatprep.subr.mxu0 %v2542_v58 }
 0x78b   :  { %1834 = vmatprep.subr.mxu1 %v2542_v58  ;;  %1862 = vmatpush3.msra.mxu0 %v1474_v19 }
 0x78c   :  { %1835 = vmatpush3.msra.mxu1 %v2444_v20  ;;  %v1473_v20 = vld [vmem:[#allocation12 + $0x28] sm:$0xff]  ;;  %1863 = vmatprep.subr.mxu0 %v2542_v58 }
 0x78d   :  { %1836 = vmatprep.subr.mxu1 %v2542_v58  ;;  %1864 = vmatpush3.msra.mxu0 %v1473_v20 }
 0x78e   :  { %1837 = vmatpush3.msra.mxu1 %v2451_v21  ;;  %v1472_v21 = vld [vmem:[#allocation12 + $0x20] sm:$0xff]  ;;  %1865 = vmatprep.subr.mxu0 %v2542_v58 }
 0x78f   :  { %1838 = vmatprep.subr.mxu1 %v2542_v58  ;;  %1866 = vmatpush3.msra.mxu0 %v1472_v21 }
 0x790   :  { %1839 = vmatpush3.msra.mxu1 %v2458_v23  ;;  %v1471_v23 = vld [vmem:[#allocation12 + $0x18] sm:$0xff]  ;;  %1867 = vmatprep.subr.mxu0 %v2542_v58 }
 0x791   :  { %1840 = vmatprep.subr.mxu1 %v2542_v58  ;;  %1868 = vmatpush3.msra.mxu0 %v1471_v23 }
 0x792   :  { %1841 = vmatpush3.msra.mxu1 %v2471_v28  ;;  %v1470_v28 = vld [vmem:[#allocation12 + $0x10] sm:$0xff]  ;;  %1869 = vmatprep.subr.mxu0 %v2542_v58 }
 0x793   :  { %1842 = vmatprep.subr.mxu1 %v2542_v58  ;;  %1870 = vmatpush3.msra.mxu0 %v1470_v28 }
 0x794   :  { %1843 = vmatpush3.msra.mxu1 %v2478_v29  ;;  %v1469_v29 = vld [vmem:[#allocation12 + $0x8] sm:$0xff]  ;;  %1871 = vmatprep.subr.mxu0 %v2542_v58 }
 0x795   :  { %1844 = vmatprep.subr.mxu1 %v2542_v58  ;;  %1872 = vmatpush3.msra.mxu0 %v1469_v29 }
 0x796   :  { %1845 = vmatpush3.msra.mxu1 %v2485_v31  ;;  %v1970_v31 = vpop.eup %1969  ;;  %1873 = vmatprep.subr.mxu0 %v2542_v58 }
 0x797   :  { %1846 = vmatprep.subr.mxu1 %v2542_v58 }
 0x798   :  { %1847 = vmatpush3.msra.mxu1 %v2492_v32  ;;  %v1468_v32 = vld [vmem:[#allocation12] sm:$0xff] }
 0x799   :  { %1848 = vmatprep.subr.mxu1 %v2542_v58  ;;  %1874 = vmatpush3.msra.mxu0 %v1468_v32 }
 0x79a   :  { %1849 = vmatpush3.msra.mxu1 %v2499_v33  ;;  %v1465_v33 = vadd.f32 1.0, %v1970_v31 }
 0x79b   :  { %1850 = vmatprep.subr.mxu1 %v2542_v58 }
 0x79c   :  { %1851 = vmatpush3.msra.mxu1 %v2505_v34  ;;  %1971 = vrcp.f32 %v1465_v33 }
 0x79d   :  { %1852 = vmatprep.subr.mxu1 %v2542_v58 }
 0x79e   :  { %1853 = vmatpush3.msra.mxu1 %v2511_v35 }
 0x79f   :  { %1854 = vmatprep.subr.mxu1 %v2542_v58 }
 0x7a0   :  { %1855 = vmatpush3.msra.mxu1 %v2518_v36 }
 0x7a9   :  { %v1972_v34 = vpop.eup %1971 }
 0x7aa   :  { %v1467_v35 = vmul.f32 %v1972_v34, %v1461_v11 }
 0x7ac   :  { %1876 = vmatmul.mubr.msk.f32.vlgmr.msra.gmra.mxu0 %vm114_vm0, %v1467_v35 }
 0x841   :  { %v1690_v36 = vpop.f32.mrf.mxu1  ;;  %v1326_v40 = vpop.f32.mrf.mxu0 }
 0x843   :  { %v1691_v41 = vpop.f32.mrf.mxu1  ;;  %v1822_v42 = vpop.f32.mrf.mxu0 }
 0x844   :  { %v1692_v43 = vadd.f32 %v1691_v41, %v1690_v36 }
 0x845   :  { %v1693_v44 = vpop.f32.mrf.mxu1  ;;  %v1329_v45 = vpop.f32.mrf.mxu0 }
 0x846   :  { %v1327_v46 = vadd.f32 %v1692_v43, %v1326_v40 }
 0x847   :  { %v1694_v47 = vpop.f32.mrf.mxu1  ;;  %v1823_v0 = vpop.f32.mrf.mxu0 }
 0x848   :  { %v1332_v48 = vrot.slane %v1327_v46, 4  ;;  %v1338_v49 = vmul.f32 %v1327_v46, %v1327_v46 }
 0x84a   :  { %v1333_v50 = vadd.f32 %v1332_v48, %v1327_v46  ;;  %v1339_v58 = vrot.slane %v1338_v49, 4 }
 0x84c   :  { %v1334_v51 = vrot.slane %v1333_v50, 2  ;;  %v1340_v52 = vadd.f32 %v1339_v58, %v1338_v49 }
 0x84e   :  { %v1335_v53 = vadd.f32 %v1334_v51, %v1333_v50  ;;  %v1341_v54 = vrot.slane %v1340_v52, 2 }
 0x850   :  { %v1336_v55 = vrot.slane %v1335_v53, 1  ;;  %v1342_v57 = vadd.f32 %v1341_v54, %v1340_v52 }
 0x852   :  { %v1343_v59 = vrot.slane %v1342_v57, 1  ;;  %v1337_v60 = vadd.f32 %v1336_v55, %v1335_v53 }
 0x854   :  { %v1344_v61 = vadd.f32 %v1343_v59, %v1342_v57 }
 0x856   :  { %v1345_v56 = vsel %vm292_vm5, %v1337_v60, %v1344_v61 }
 0x857   :  { %1857 = vmatmul.mubr.f32.vlgmr.msra.gmra.mxu1 %v1345_v56 }
 0x86c   :  { %v1546_v62 = vpop.f32.mrf.mxu0 }
 0x86d   :  { %v1547_v25 = vadd.f32 %v1546_v62, %v1476_v15 }
 0x86e   :  { %v1877_v63 = vpop.f32.mrf.mxu0 }
 0x86f   :  { %v1553_v38 = vrot.slane %v1547_v25, %v2361_v17 }
 0x917   :  { %v1428_v2 = vpop.f32.mrf.mxu1 }
 0x918   :  { %v1432_v3 = vmul.f32 0.001953125, %v1428_v2 }
 0x919   :  { %v1858_v4 = vpop.f32.mrf.mxu1 }
 0x91a   :  { %v1433_v37 = vmul.f32 %v1432_v3, %v1432_v3 }
 0x91c   :  { %v1435_v5 = vrot.slane %v1433_v37, 7 }
 0x91e   :  { %v1437_v6 = vsub.f32 %v1432_v3, %v1435_v5 }
 0x920   :  { %v1438_v7 = vadd.f32 1e-05, %v1437_v6 }
 0x922   :  { %1973 = vrsqrt.f32 %v1438_v7 }
 0x92f   :  { %v1974_v10 = vpop.eup %1973 }
 0x930   :  { %v1444_v1 = vmul.f32 %v1974_v10, %v1442_v9 }
 0x932   :  { %v1447_v16 = vrot.slane %v1444_v1, 1  ;;  %v1454_v26 = vrot.slane %v1444_v1, %v2355_v12 }
 0x934   :  { %v1449_v24 = vmul.f32 %v1447_v16, %v1432_v3  ;;  %v1455_v30 = vmul.f32 %v1454_v26, %v1327_v46 }
 0x936   :  { %v1450_v27 = vsub.f32 %v1445_v22, %v1449_v24 }
 0x938   :  { %v1459_v39 = vrot.slane %v1450_v27, %v2361_v17 }
 0x93a   :  { %v1460_v11 = vadd.f32 %v1459_v39, %v1455_v30 }
 0x93c   :  { %v1554_v13 = vadd.f32 %v1553_v38, %v1460_v11 }
 0x93e   :  { %1555 = vst [vmem:[#allocation13] sm:$0xff] %v1554_v13 }
 0x93f   :  { %2087 = shalt.err (!%p2084_p1)
}
 0x940   :  { %1565 = dma.vmem_to_hbm [thread:$0]  %s1563_s25, 128, %s2695_s14, [#allocation6]  }
 0x941   :  { %2102 = dma.done.wait [#allocation6], 128  }
 0x942   :  { %2103 = vsyncadd [#allocation6], 4294967168 }
 0x943   :  { %1569 = vsyncpa [#allocation5], 1 }
 0x944   :  { %1570 = vsyncpa [#allocation8], 1 }
 0x945   :  { %1571 = vsyncpa [#allocation11], 1 }
 0x946   :  { %1572 = vsyncpa [#allocation6], 1 }

</bundles_post_ra>
